<compile_context>
chip_gen: v6e
topology: v6e:2x2x1
jax: 0.10.0
libtpu: 0.0.40
codegen_flags: <defaults>
</compile_context>

<pallas_src>
import jax
import jax.numpy as jnp
from jax.experimental import pallas as pl
from jax.experimental.pallas import tpu as pltpu

BN_EPS = 1e-5
LANE = 128         # lane width: pad hidden / label dims to multiples of this
BATCH_TILE = 8     # batch rows per grid step (sublane aligned)


def _round_up(x, m):
    return ((x + m - 1) // m) * m


def _pad2d(a, rows, cols):
    return jnp.pad(a, ((0, rows - a.shape[0]), (0, cols - a.shape[1])))


def fasttext_kernel(tok_ref, wrd_ref,                       # scalar prefetch (SMEM)
                    mask_ref, t1_ref, t2_ref, bias_ref,     # VMEM inputs
                    wfc_ref, bfc_ref,
                    o_ref,                                  # VMEM output
                    acc_ref):                               # VMEM scratch
    BT, S = mask_ref.shape
    bt = pl.program_id(0)
    bias = bias_ref[...]                    # (1, H_pad), hoisted out of the loops

    # --- row gather (projector + BN already folded into the tables) + ReLU ---
    # --- and per-batch-row sum over the sequence (the pooling numerator)   ---
    for r in range(BT):                     # static unroll, BT = 8 rows / tile
        b = bt * BT + r                     # row index in the padded batch
        row_acc = jnp.zeros_like(bias)
        for s in range(S):                  # static unroll over the sequence
            it = tok_ref[b, s]              # SMEM scalar reads (ids live on the
            iw = wrd_ref[b, s]              # scalar path, not in padded VMEM)
            h = (t1_ref[pl.ds(it, 1), :]    # dynamic single-row gathers
                 + t2_ref[pl.ds(iw, 1), :]
                 + bias)
            row_acc = row_acc + jnp.maximum(h, 0.0)
        acc_ref[pl.ds(r, 1), :] = row_acc

    # --- mean over valid tokens (matches torch: pads still contribute to the
    # --- numerator; only the mask sum forms the denominator) -----------------
    denom = jnp.sum(mask_ref[...], axis=1, keepdims=True)          # (BT, 1)
    denom = jnp.maximum(denom, 1.0)          # guard padded / all-zero-mask rows
    # NOTE: pl.reciprocal(..., approx=True) is the production choice (EUP slot);
    # exact reciprocal kept here for strict parity with the f32 reference.
    pooled = acc_ref[...] * pl.reciprocal(denom, approx=False)     # (BT, H_pad)

    # --- final fc (lane-dense padded shapes, single MXU matmul) --------------
    o_ref[...] = (jnp.dot(pooled, wfc_ref[...],
                          preferred_element_type=jnp.float32)
                  + bfc_ref[...])


def fasttext_forward(token_ids, word_ids, attention_mask, params):
    B, S = token_ids.shape
    V1, D1 = params["emb1"].shape
    V2, _ = params["emb2"].shape
    H = params["w_proj"].shape[1]
    L = params["w_fc"].shape[1]

    # --- one-time folding of projector Linear + eval BatchNorm into tables ---
    bn_scale = params["bn_gamma"] / jnp.sqrt(params["bn_var"] + BN_EPS)   # (1,H)
    t1 = jnp.dot(params["emb1"], params["w_proj"][:D1]) * bn_scale        # (V1,H)
    t2 = jnp.dot(params["emb2"], params["w_proj"][D1:]) * bn_scale        # (V2,H)
    bias = (params["b_proj"] - params["bn_mean"]) * bn_scale + params["bn_beta"]

    # --- lane/sublane-dense padding ------------------------------------------
    H_pad = _round_up(H, LANE)
    L_pad = _round_up(L, LANE)
    B_pad = _round_up(B, BATCH_TILE)

    t1p = _pad2d(t1, V1, H_pad)
    t2p = _pad2d(t2, V2, H_pad)
    biasp = _pad2d(bias, 1, H_pad)
    wfcp = _pad2d(params["w_fc"], H_pad, L_pad)
    bfcp = _pad2d(params["b_fc"], 1, L_pad)

    tokp = _pad2d(token_ids.astype(jnp.int32), B_pad, S)     # padded ids -> row 0
    wrdp = _pad2d(word_ids.astype(jnp.int32), B_pad, S)
    maskp = _pad2d(attention_mask.astype(jnp.float32), B_pad, S)

    grid_spec = pltpu.PrefetchScalarGridSpec(
        num_scalar_prefetch=2,                    # token_ids, word_ids -> SMEM
        grid=(B_pad // BATCH_TILE,),
        in_specs=[
            pl.BlockSpec((BATCH_TILE, S), lambda i, tok, wrd: (i, 0)),   # mask
            pl.BlockSpec((V1, H_pad), lambda i, tok, wrd: (0, 0)),       # T1
            pl.BlockSpec((V2, H_pad), lambda i, tok, wrd: (0, 0)),       # T2
            pl.BlockSpec((1, H_pad), lambda i, tok, wrd: (0, 0)),        # bias
            pl.BlockSpec((H_pad, L_pad), lambda i, tok, wrd: (0, 0)),    # w_fc
            pl.BlockSpec((1, L_pad), lambda i, tok, wrd: (0, 0)),        # b_fc
        ],
        out_specs=pl.BlockSpec((BATCH_TILE, L_pad), lambda i, tok, wrd: (i, 0)),
        scratch_shapes=[pltpu.VMEM((BATCH_TILE, H_pad), jnp.float32)],
    )

    out = pl.pallas_call(
        fasttext_kernel,
        out_shape=jax.ShapeDtypeStruct((B_pad, L_pad), jnp.float32),
        grid_spec=grid_spec,
        compiler_params=pltpu.CompilerParams(
            dimension_semantics=("parallel",),     # batch tiles across TCs
            vmem_limit_bytes=32 * 1024 * 1024),
    )(tokp, wrdp, maskp, t1p, t2p, biasp, wfcp, bfcp)

    return out[:B, :L]


def fasttext_reference(token_ids, word_ids, attention_mask, params):
    """Pure-JAX reference matching the PyTorch forward (BatchNorm in eval)."""
    B, S = token_ids.shape
    x1 = params["emb1"][token_ids]          # (B, S, D1)
    x2 = params["emb2"][word_ids]           # (B, S, D2)
    x = jnp.concatenate([x1, x2], axis=-1)  # (B, S, E)
    E = x.shape[-1]
    h = x.reshape(-1, E) @ params["w_proj"] + params["b_proj"]
    h = ((h - params["bn_mean"]) / jnp.sqrt(params["bn_var"] + BN_EPS)
         * params["bn_gamma"] + params["bn_beta"])
    h = jnp.maximum(h, 0.0).reshape(B, S, -1)
    pooled = jnp.sum(h, axis=1) / jnp.sum(attention_mask.astype(jnp.float32),
                                          axis=1, keepdims=True)
    return pooled @ params["w_fc"] + params["b_fc"]


def make_params(key, vocab1, vocab2, d1, d2, hidden, labels):
    ks = jax.random.split(key, 9)
    scale = 0.02
    return {
        "emb1": jax.random.normal(ks[0], (vocab1, d1), jnp.float32) * scale,
        "emb2": jax.random.normal(ks[1], (vocab2, d2), jnp.float32) * scale,
        # projector Linear(E = d1 + d2 -> hidden), stored (in, out) like x @ W
        "w_proj": jax.random.normal(ks[2], (d1 + d2, hidden), jnp.float32) * scale,
        "b_proj": jax.random.normal(ks[3], (1, hidden), jnp.float32) * scale,
        "bn_gamma": 1.0 + jax.random.normal(ks[4], (1, hidden), jnp.float32) * scale,
        "bn_beta": jax.random.normal(ks[5], (1, hidden), jnp.float32) * scale,
        # non-trivial running stats so the BN folding is actually exercised
        "bn_mean": jax.random.normal(ks[6], (1, hidden), jnp.float32) * 0.05,
        "bn_var": 1.0 + jax.random.uniform(ks[7], (1, hidden), jnp.float32) * 0.5,
        "w_fc": jax.random.normal(ks[8], (hidden, labels), jnp.float32) * scale,
        "b_fc": jnp.zeros((1, labels), jnp.float32),
    }


if __name__ == "__main__":
    # Small shapes consistent with the module's forward.
    B, S = 2, 8
    VOCAB1, VOCAB2 = 32, 48
    D1, D2 = 16, 16          # embedding_dim = D1 + D2 = 32
    HIDDEN = 32
    LABELS = 8

    key = jax.random.PRNGKey(0)
    k_tok, k_wrd, k_len, k_param = jax.random.split(key, 4)

    token_ids = jax.random.randint(k_tok, (B, S), 0, VOCAB1, dtype=jnp.int32)
    word_ids = jax.random.randint(k_wrd, (B, S), 0, VOCAB2, dtype=jnp.int32)
    lengths = jax.random.randint(k_len, (B,), 3, S + 1, dtype=jnp.int32)
    attention_mask = (jnp.arange(S)[None, :] < lengths[:, None]).astype(jnp.float32)

    params = make_params(k_param, VOCAB1, VOCAB2, D1, D2, HIDDEN, LABELS)

    logits = fasttext_forward(token_ids, word_ids, attention_mask, params)
    jax.block_until_ready(logits)

    ref = fasttext_reference(token_ids, word_ids, attention_mask, params)
    assert logits.shape == (B, LABELS)
    assert jnp.allclose(logits, ref, atol=1e-4, rtol=1e-4), "mismatch vs reference"

    print("KERNEL_OK")
</pallas_src>

<mosaic_0001>
module attributes {stable_mosaic.version = 11 : i64} {
  func.func @fasttext_kernel(%arg0: i32, %arg1: memref<8x8xi32, #tpu.memory_space<smem>>, %arg2: memref<8x8xi32, #tpu.memory_space<smem>>, %arg3: memref<8x8xf32, #tpu.memory_space<vmem>>, %arg4: memref<32x128xf32, #tpu.memory_space<vmem>>, %arg5: memref<48x128xf32, #tpu.memory_space<vmem>>, %arg6: memref<1x128xf32, #tpu.memory_space<vmem>>, %arg7: memref<128x128xf32, #tpu.memory_space<vmem>>, %arg8: memref<1x128xf32, #tpu.memory_space<vmem>>, %arg9: memref<8x128xf32, #tpu.memory_space<vmem>>, %arg10: memref<8x128xf32, #tpu.memory_space<vmem>>) attributes {dimension_semantics = [#tpu.dimension_semantics<parallel>], iteration_bounds = array<i64: 1>, scalar_prefetch = 2 : i64, scratch_operands = 1 : i64, tpu.core_type = #tpu.core_type<tc>, window_params = [{transform_indices = @transform_0, window_bounds = array<i64: 8, 8>}, {pipeline_mode = #tpu.pipeline_mode<synchronous>, transform_indices = @transform_1, window_bounds = array<i64: 32, 128>}, {pipeline_mode = #tpu.pipeline_mode<synchronous>, transform_indices = @transform_2, window_bounds = array<i64: 48, 128>}, {pipeline_mode = #tpu.pipeline_mode<synchronous>, transform_indices = @transform_3, window_bounds = array<i64: 1, 128>}, {pipeline_mode = #tpu.pipeline_mode<synchronous>, transform_indices = @transform_4, window_bounds = array<i64: 128, 128>}, {pipeline_mode = #tpu.pipeline_mode<synchronous>, transform_indices = @transform_5, window_bounds = array<i64: 1, 128>}, {transform_indices = @transform_6, window_bounds = array<i64: 8, 128>}]} {
    %c0 = arith.constant 0 : index
    %c0_0 = arith.constant 0 : index
    %0 = vector.load %arg6[%c0, %c0_0] : memref<1x128xf32, #tpu.memory_space<vmem>>, vector<1x128xf32>
    %c8_i32 = arith.constant 8 : i32
    %1 = arith.muli %arg0, %c8_i32 : i32
    %c0_i32 = arith.constant 0 : i32
    %2 = arith.addi %1, %c0_i32 : i32
    %cst = arith.constant 0.000000e+00 : f32
    %3 = vector.broadcast %cst : f32 to vector<1x128xf32>
    %4 = arith.index_cast %2 : i32 to index
    %c0_1 = arith.constant 0 : index
    %5 = memref.load %arg1[%4, %c0_1] : memref<8x8xi32, #tpu.memory_space<smem>>
    %6 = arith.index_cast %2 : i32 to index
    %c0_2 = arith.constant 0 : index
    %7 = memref.load %arg2[%6, %c0_2] : memref<8x8xi32, #tpu.memory_space<smem>>
    %8 = arith.index_cast %5 : i32 to index
    %c0_3 = arith.constant 0 : index
    %9 = vector.load %arg4[%8, %c0_3] : memref<32x128xf32, #tpu.memory_space<vmem>>, vector<1x128xf32>
    %10 = arith.index_cast %7 : i32 to index
    %c0_4 = arith.constant 0 : index
    %11 = vector.load %arg5[%10, %c0_4] : memref<48x128xf32, #tpu.memory_space<vmem>>, vector<1x128xf32>
    %12 = arith.addf %9, %11 : vector<1x128xf32>
    %13 = arith.addf %12, %0 : vector<1x128xf32>
    %cst_5 = arith.constant 0.000000e+00 : f32
    %14 = vector.broadcast %cst_5 : f32 to vector<1x128xf32>
    %15 = arith.maximumf %13, %14 : vector<1x128xf32>
    %16 = arith.addf %3, %15 : vector<1x128xf32>
    %17 = arith.index_cast %2 : i32 to index
    %c1 = arith.constant 1 : index
    %18 = memref.load %arg1[%17, %c1] : memref<8x8xi32, #tpu.memory_space<smem>>
    %19 = arith.index_cast %2 : i32 to index
    %c1_6 = arith.constant 1 : index
    %20 = memref.load %arg2[%19, %c1_6] : memref<8x8xi32, #tpu.memory_space<smem>>
    %21 = arith.index_cast %18 : i32 to index
    %c0_7 = arith.constant 0 : index
    %22 = vector.load %arg4[%21, %c0_7] : memref<32x128xf32, #tpu.memory_space<vmem>>, vector<1x128xf32>
    %23 = arith.index_cast %20 : i32 to index
    %c0_8 = arith.constant 0 : index
    %24 = vector.load %arg5[%23, %c0_8] : memref<48x128xf32, #tpu.memory_space<vmem>>, vector<1x128xf32>
    %25 = arith.addf %22, %24 : vector<1x128xf32>
    %26 = arith.addf %25, %0 : vector<1x128xf32>
    %cst_9 = arith.constant 0.000000e+00 : f32
    %27 = vector.broadcast %cst_9 : f32 to vector<1x128xf32>
    %28 = arith.maximumf %26, %27 : vector<1x128xf32>
    %29 = arith.addf %16, %28 : vector<1x128xf32>
    %30 = arith.index_cast %2 : i32 to index
    %c2 = arith.constant 2 : index
    %31 = memref.load %arg1[%30, %c2] : memref<8x8xi32, #tpu.memory_space<smem>>
    %32 = arith.index_cast %2 : i32 to index
    %c2_10 = arith.constant 2 : index
    %33 = memref.load %arg2[%32, %c2_10] : memref<8x8xi32, #tpu.memory_space<smem>>
    %34 = arith.index_cast %31 : i32 to index
    %c0_11 = arith.constant 0 : index
    %35 = vector.load %arg4[%34, %c0_11] : memref<32x128xf32, #tpu.memory_space<vmem>>, vector<1x128xf32>
    %36 = arith.index_cast %33 : i32 to index
    %c0_12 = arith.constant 0 : index
    %37 = vector.load %arg5[%36, %c0_12] : memref<48x128xf32, #tpu.memory_space<vmem>>, vector<1x128xf32>
    %38 = arith.addf %35, %37 : vector<1x128xf32>
    %39 = arith.addf %38, %0 : vector<1x128xf32>
    %cst_13 = arith.constant 0.000000e+00 : f32
    %40 = vector.broadcast %cst_13 : f32 to vector<1x128xf32>
    %41 = arith.maximumf %39, %40 : vector<1x128xf32>
    %42 = arith.addf %29, %41 : vector<1x128xf32>
    %43 = arith.index_cast %2 : i32 to index
    %c3 = arith.constant 3 : index
    %44 = memref.load %arg1[%43, %c3] : memref<8x8xi32, #tpu.memory_space<smem>>
    %45 = arith.index_cast %2 : i32 to index
    %c3_14 = arith.constant 3 : index
    %46 = memref.load %arg2[%45, %c3_14] : memref<8x8xi32, #tpu.memory_space<smem>>
    %47 = arith.index_cast %44 : i32 to index
    %c0_15 = arith.constant 0 : index
    %48 = vector.load %arg4[%47, %c0_15] : memref<32x128xf32, #tpu.memory_space<vmem>>, vector<1x128xf32>
    %49 = arith.index_cast %46 : i32 to index
    %c0_16 = arith.constant 0 : index
    %50 = vector.load %arg5[%49, %c0_16] : memref<48x128xf32, #tpu.memory_space<vmem>>, vector<1x128xf32>
    %51 = arith.addf %48, %50 : vector<1x128xf32>
    %52 = arith.addf %51, %0 : vector<1x128xf32>
    %cst_17 = arith.constant 0.000000e+00 : f32
    %53 = vector.broadcast %cst_17 : f32 to vector<1x128xf32>
    %54 = arith.maximumf %52, %53 : vector<1x128xf32>
    %55 = arith.addf %42, %54 : vector<1x128xf32>
    %56 = arith.index_cast %2 : i32 to index
    %c4 = arith.constant 4 : index
    %57 = memref.load %arg1[%56, %c4] : memref<8x8xi32, #tpu.memory_space<smem>>
    %58 = arith.index_cast %2 : i32 to index
    %c4_18 = arith.constant 4 : index
    %59 = memref.load %arg2[%58, %c4_18] : memref<8x8xi32, #tpu.memory_space<smem>>
    %60 = arith.index_cast %57 : i32 to index
    %c0_19 = arith.constant 0 : index
    %61 = vector.load %arg4[%60, %c0_19] : memref<32x128xf32, #tpu.memory_space<vmem>>, vector<1x128xf32>
    %62 = arith.index_cast %59 : i32 to index
    %c0_20 = arith.constant 0 : index
    %63 = vector.load %arg5[%62, %c0_20] : memref<48x128xf32, #tpu.memory_space<vmem>>, vector<1x128xf32>
    %64 = arith.addf %61, %63 : vector<1x128xf32>
    %65 = arith.addf %64, %0 : vector<1x128xf32>
    %cst_21 = arith.constant 0.000000e+00 : f32
    %66 = vector.broadcast %cst_21 : f32 to vector<1x128xf32>
    %67 = arith.maximumf %65, %66 : vector<1x128xf32>
    %68 = arith.addf %55, %67 : vector<1x128xf32>
    %69 = arith.index_cast %2 : i32 to index
    %c5 = arith.constant 5 : index
    %70 = memref.load %arg1[%69, %c5] : memref<8x8xi32, #tpu.memory_space<smem>>
    %71 = arith.index_cast %2 : i32 to index
    %c5_22 = arith.constant 5 : index
    %72 = memref.load %arg2[%71, %c5_22] : memref<8x8xi32, #tpu.memory_space<smem>>
    %73 = arith.index_cast %70 : i32 to index
    %c0_23 = arith.constant 0 : index
    %74 = vector.load %arg4[%73, %c0_23] : memref<32x128xf32, #tpu.memory_space<vmem>>, vector<1x128xf32>
    %75 = arith.index_cast %72 : i32 to index
    %c0_24 = arith.constant 0 : index
    %76 = vector.load %arg5[%75, %c0_24] : memref<48x128xf32, #tpu.memory_space<vmem>>, vector<1x128xf32>
    %77 = arith.addf %74, %76 : vector<1x128xf32>
    %78 = arith.addf %77, %0 : vector<1x128xf32>
    %cst_25 = arith.constant 0.000000e+00 : f32
    %79 = vector.broadcast %cst_25 : f32 to vector<1x128xf32>
    %80 = arith.maximumf %78, %79 : vector<1x128xf32>
    %81 = arith.addf %68, %80 : vector<1x128xf32>
    %82 = arith.index_cast %2 : i32 to index
    %c6 = arith.constant 6 : index
    %83 = memref.load %arg1[%82, %c6] : memref<8x8xi32, #tpu.memory_space<smem>>
    %84 = arith.index_cast %2 : i32 to index
    %c6_26 = arith.constant 6 : index
    %85 = memref.load %arg2[%84, %c6_26] : memref<8x8xi32, #tpu.memory_space<smem>>
    %86 = arith.index_cast %83 : i32 to index
    %c0_27 = arith.constant 0 : index
    %87 = vector.load %arg4[%86, %c0_27] : memref<32x128xf32, #tpu.memory_space<vmem>>, vector<1x128xf32>
    %88 = arith.index_cast %85 : i32 to index
    %c0_28 = arith.constant 0 : index
    %89 = vector.load %arg5[%88, %c0_28] : memref<48x128xf32, #tpu.memory_space<vmem>>, vector<1x128xf32>
    %90 = arith.addf %87, %89 : vector<1x128xf32>
    %91 = arith.addf %90, %0 : vector<1x128xf32>
    %cst_29 = arith.constant 0.000000e+00 : f32
    %92 = vector.broadcast %cst_29 : f32 to vector<1x128xf32>
    %93 = arith.maximumf %91, %92 : vector<1x128xf32>
    %94 = arith.addf %81, %93 : vector<1x128xf32>
    %95 = arith.index_cast %2 : i32 to index
    %c7 = arith.constant 7 : index
    %96 = memref.load %arg1[%95, %c7] : memref<8x8xi32, #tpu.memory_space<smem>>
    %97 = arith.index_cast %2 : i32 to index
    %c7_30 = arith.constant 7 : index
    %98 = memref.load %arg2[%97, %c7_30] : memref<8x8xi32, #tpu.memory_space<smem>>
    %99 = arith.index_cast %96 : i32 to index
    %c0_31 = arith.constant 0 : index
    %100 = vector.load %arg4[%99, %c0_31] : memref<32x128xf32, #tpu.memory_space<vmem>>, vector<1x128xf32>
    %101 = arith.index_cast %98 : i32 to index
    %c0_32 = arith.constant 0 : index
    %102 = vector.load %arg5[%101, %c0_32] : memref<48x128xf32, #tpu.memory_space<vmem>>, vector<1x128xf32>
    %103 = arith.addf %100, %102 : vector<1x128xf32>
    %104 = arith.addf %103, %0 : vector<1x128xf32>
    %cst_33 = arith.constant 0.000000e+00 : f32
    %105 = vector.broadcast %cst_33 : f32 to vector<1x128xf32>
    %106 = arith.maximumf %104, %105 : vector<1x128xf32>
    %107 = arith.addf %94, %106 : vector<1x128xf32>
    %c0_34 = arith.constant 0 : index
    %c0_35 = arith.constant 0 : index
    %108 = vector.load %arg10[%c0_34, %c0_35] : memref<8x128xf32, #tpu.memory_space<vmem>>, vector<1x128xf32>
    tpu.vector_store %arg10[%c0_34, %c0_35], %107 {strides = array<i32>} : memref<8x128xf32, #tpu.memory_space<vmem>>, vector<1x128xf32>,
    %c8_i32_36 = arith.constant 8 : i32
    %109 = arith.muli %arg0, %c8_i32_36 : i32
    %c1_i32 = arith.constant 1 : i32
    %110 = arith.addi %109, %c1_i32 : i32
    %cst_37 = arith.constant 0.000000e+00 : f32
    %111 = vector.broadcast %cst_37 : f32 to vector<1x128xf32>
    %112 = arith.index_cast %110 : i32 to index
    %c0_38 = arith.constant 0 : index
    %113 = memref.load %arg1[%112, %c0_38] : memref<8x8xi32, #tpu.memory_space<smem>>
    %114 = arith.index_cast %110 : i32 to index
    %c0_39 = arith.constant 0 : index
    %115 = memref.load %arg2[%114, %c0_39] : memref<8x8xi32, #tpu.memory_space<smem>>
    %116 = arith.index_cast %113 : i32 to index
    %c0_40 = arith.constant 0 : index
    %117 = vector.load %arg4[%116, %c0_40] : memref<32x128xf32, #tpu.memory_space<vmem>>, vector<1x128xf32>
    %118 = arith.index_cast %115 : i32 to index
    %c0_41 = arith.constant 0 : index
    %119 = vector.load %arg5[%118, %c0_41] : memref<48x128xf32, #tpu.memory_space<vmem>>, vector<1x128xf32>
    %120 = arith.addf %117, %119 : vector<1x128xf32>
    %121 = arith.addf %120, %0 : vector<1x128xf32>
    %cst_42 = arith.constant 0.000000e+00 : f32
    %122 = vector.broadcast %cst_42 : f32 to vector<1x128xf32>
    %123 = arith.maximumf %121, %122 : vector<1x128xf32>
    %124 = arith.addf %111, %123 : vector<1x128xf32>
    %125 = arith.index_cast %110 : i32 to index
    %c1_43 = arith.constant 1 : index
    %126 = memref.load %arg1[%125, %c1_43] : memref<8x8xi32, #tpu.memory_space<smem>>
    %127 = arith.index_cast %110 : i32 to index
    %c1_44 = arith.constant 1 : index
    %128 = memref.load %arg2[%127, %c1_44] : memref<8x8xi32, #tpu.memory_space<smem>>
    %129 = arith.index_cast %126 : i32 to index
    %c0_45 = arith.constant 0 : index
    %130 = vector.load %arg4[%129, %c0_45] : memref<32x128xf32, #tpu.memory_space<vmem>>, vector<1x128xf32>
    %131 = arith.index_cast %128 : i32 to index
    %c0_46 = arith.constant 0 : index
    %132 = vector.load %arg5[%131, %c0_46] : memref<48x128xf32, #tpu.memory_space<vmem>>, vector<1x128xf32>
    %133 = arith.addf %130, %132 : vector<1x128xf32>
    %134 = arith.addf %133, %0 : vector<1x128xf32>
    %cst_47 = arith.constant 0.000000e+00 : f32
    %135 = vector.broadcast %cst_47 : f32 to vector<1x128xf32>
    %136 = arith.maximumf %134, %135 : vector<1x128xf32>
    %137 = arith.addf %124, %136 : vector<1x128xf32>
    %138 = arith.index_cast %110 : i32 to index
    %c2_48 = arith.constant 2 : index
    %139 = memref.load %arg1[%138, %c2_48] : memref<8x8xi32, #tpu.memory_space<smem>>
    %140 = arith.index_cast %110 : i32 to index
    %c2_49 = arith.constant 2 : index
    %141 = memref.load %arg2[%140, %c2_49] : memref<8x8xi32, #tpu.memory_space<smem>>
    %142 = arith.index_cast %139 : i32 to index
    %c0_50 = arith.constant 0 : index
    %143 = vector.load %arg4[%142, %c0_50] : memref<32x128xf32, #tpu.memory_space<vmem>>, vector<1x128xf32>
    %144 = arith.index_cast %141 : i32 to index
    %c0_51 = arith.constant 0 : index
    %145 = vector.load %arg5[%144, %c0_51] : memref<48x128xf32, #tpu.memory_space<vmem>>, vector<1x128xf32>
    %146 = arith.addf %143, %145 : vector<1x128xf32>
    %147 = arith.addf %146, %0 : vector<1x128xf32>
    %cst_52 = arith.constant 0.000000e+00 : f32
    %148 = vector.broadcast %cst_52 : f32 to vector<1x128xf32>
    %149 = arith.maximumf %147, %148 : vector<1x128xf32>
    %150 = arith.addf %137, %149 : vector<1x128xf32>
    %151 = arith.index_cast %110 : i32 to index
    %c3_53 = arith.constant 3 : index
    %152 = memref.load %arg1[%151, %c3_53] : memref<8x8xi32, #tpu.memory_space<smem>>
    %153 = arith.index_cast %110 : i32 to index
    %c3_54 = arith.constant 3 : index
    %154 = memref.load %arg2[%153, %c3_54] : memref<8x8xi32, #tpu.memory_space<smem>>
    %155 = arith.index_cast %152 : i32 to index
    %c0_55 = arith.constant 0 : index
    %156 = vector.load %arg4[%155, %c0_55] : memref<32x128xf32, #tpu.memory_space<vmem>>, vector<1x128xf32>
    %157 = arith.index_cast %154 : i32 to index
    %c0_56 = arith.constant 0 : index
    %158 = vector.load %arg5[%157, %c0_56] : memref<48x128xf32, #tpu.memory_space<vmem>>, vector<1x128xf32>
    %159 = arith.addf %156, %158 : vector<1x128xf32>
    %160 = arith.addf %159, %0 : vector<1x128xf32>
    %cst_57 = arith.constant 0.000000e+00 : f32
    %161 = vector.broadcast %cst_57 : f32 to vector<1x128xf32>
    %162 = arith.maximumf %160, %161 : vector<1x128xf32>
    %163 = arith.addf %150, %162 : vector<1x128xf32>
    %164 = arith.index_cast %110 : i32 to index
    %c4_58 = arith.constant 4 : index
    %165 = memref.load %arg1[%164, %c4_58] : memref<8x8xi32, #tpu.memory_space<smem>>
    %166 = arith.index_cast %110 : i32 to index
    %c4_59 = arith.constant 4 : index
    %167 = memref.load %arg2[%166, %c4_59] : memref<8x8xi32, #tpu.memory_space<smem>>
    %168 = arith.index_cast %165 : i32 to index
    %c0_60 = arith.constant 0 : index
    %169 = vector.load %arg4[%168, %c0_60] : memref<32x128xf32, #tpu.memory_space<vmem>>, vector<1x128xf32>
    %170 = arith.index_cast %167 : i32 to index
    %c0_61 = arith.constant 0 : index
    %171 = vector.load %arg5[%170, %c0_61] : memref<48x128xf32, #tpu.memory_space<vmem>>, vector<1x128xf32>
    %172 = arith.addf %169, %171 : vector<1x128xf32>
    %173 = arith.addf %172, %0 : vector<1x128xf32>
    %cst_62 = arith.constant 0.000000e+00 : f32
    %174 = vector.broadcast %cst_62 : f32 to vector<1x128xf32>
    %175 = arith.maximumf %173, %174 : vector<1x128xf32>
    %176 = arith.addf %163, %175 : vector<1x128xf32>
    %177 = arith.index_cast %110 : i32 to index
    %c5_63 = arith.constant 5 : index
    %178 = memref.load %arg1[%177, %c5_63] : memref<8x8xi32, #tpu.memory_space<smem>>
    %179 = arith.index_cast %110 : i32 to index
    %c5_64 = arith.constant 5 : index
    %180 = memref.load %arg2[%179, %c5_64] : memref<8x8xi32, #tpu.memory_space<smem>>
    %181 = arith.index_cast %178 : i32 to index
    %c0_65 = arith.constant 0 : index
    %182 = vector.load %arg4[%181, %c0_65] : memref<32x128xf32, #tpu.memory_space<vmem>>, vector<1x128xf32>
    %183 = arith.index_cast %180 : i32 to index
    %c0_66 = arith.constant 0 : index
    %184 = vector.load %arg5[%183, %c0_66] : memref<48x128xf32, #tpu.memory_space<vmem>>, vector<1x128xf32>
    %185 = arith.addf %182, %184 : vector<1x128xf32>
    %186 = arith.addf %185, %0 : vector<1x128xf32>
    %cst_67 = arith.constant 0.000000e+00 : f32
    %187 = vector.broadcast %cst_67 : f32 to vector<1x128xf32>
    %188 = arith.maximumf %186, %187 : vector<1x128xf32>
    %189 = arith.addf %176, %188 : vector<1x128xf32>
    %190 = arith.index_cast %110 : i32 to index
    %c6_68 = arith.constant 6 : index
    %191 = memref.load %arg1[%190, %c6_68] : memref<8x8xi32, #tpu.memory_space<smem>>
    %192 = arith.index_cast %110 : i32 to index
    %c6_69 = arith.constant 6 : index
    %193 = memref.load %arg2[%192, %c6_69] : memref<8x8xi32, #tpu.memory_space<smem>>
    %194 = arith.index_cast %191 : i32 to index
    %c0_70 = arith.constant 0 : index
    %195 = vector.load %arg4[%194, %c0_70] : memref<32x128xf32, #tpu.memory_space<vmem>>, vector<1x128xf32>
    %196 = arith.index_cast %193 : i32 to index
    %c0_71 = arith.constant 0 : index
    %197 = vector.load %arg5[%196, %c0_71] : memref<48x128xf32, #tpu.memory_space<vmem>>, vector<1x128xf32>
    %198 = arith.addf %195, %197 : vector<1x128xf32>
    %199 = arith.addf %198, %0 : vector<1x128xf32>
    %cst_72 = arith.constant 0.000000e+00 : f32
    %200 = vector.broadcast %cst_72 : f32 to vector<1x128xf32>
    %201 = arith.maximumf %199, %200 : vector<1x128xf32>
    %202 = arith.addf %189, %201 : vector<1x128xf32>
    %203 = arith.index_cast %110 : i32 to index
    %c7_73 = arith.constant 7 : index
    %204 = memref.load %arg1[%203, %c7_73] : memref<8x8xi32, #tpu.memory_space<smem>>
    %205 = arith.index_cast %110 : i32 to index
    %c7_74 = arith.constant 7 : index
    %206 = memref.load %arg2[%205, %c7_74] : memref<8x8xi32, #tpu.memory_space<smem>>
    %207 = arith.index_cast %204 : i32 to index
    %c0_75 = arith.constant 0 : index
    %208 = vector.load %arg4[%207, %c0_75] : memref<32x128xf32, #tpu.memory_space<vmem>>, vector<1x128xf32>
    %209 = arith.index_cast %206 : i32 to index
    %c0_76 = arith.constant 0 : index
    %210 = vector.load %arg5[%209, %c0_76] : memref<48x128xf32, #tpu.memory_space<vmem>>, vector<1x128xf32>
    %211 = arith.addf %208, %210 : vector<1x128xf32>
    %212 = arith.addf %211, %0 : vector<1x128xf32>
    %cst_77 = arith.constant 0.000000e+00 : f32
    %213 = vector.broadcast %cst_77 : f32 to vector<1x128xf32>
    %214 = arith.maximumf %212, %213 : vector<1x128xf32>
    %215 = arith.addf %202, %214 : vector<1x128xf32>
    %c1_78 = arith.constant 1 : index
    %c0_79 = arith.constant 0 : index
    %216 = vector.load %arg10[%c1_78, %c0_79] : memref<8x128xf32, #tpu.memory_space<vmem>>, vector<1x128xf32>
    tpu.vector_store %arg10[%c1_78, %c0_79], %215 {strides = array<i32>} : memref<8x128xf32, #tpu.memory_space<vmem>>, vector<1x128xf32>,
    %c8_i32_80 = arith.constant 8 : i32
    %217 = arith.muli %arg0, %c8_i32_80 : i32
    %c2_i32 = arith.constant 2 : i32
    %218 = arith.addi %217, %c2_i32 : i32
    %cst_81 = arith.constant 0.000000e+00 : f32
    %219 = vector.broadcast %cst_81 : f32 to vector<1x128xf32>
    %220 = arith.index_cast %218 : i32 to index
    %c0_82 = arith.constant 0 : index
    %221 = memref.load %arg1[%220, %c0_82] : memref<8x8xi32, #tpu.memory_space<smem>>
    %222 = arith.index_cast %218 : i32 to index
    %c0_83 = arith.constant 0 : index
    %223 = memref.load %arg2[%222, %c0_83] : memref<8x8xi32, #tpu.memory_space<smem>>
    %224 = arith.index_cast %221 : i32 to index
    %c0_84 = arith.constant 0 : index
    %225 = vector.load %arg4[%224, %c0_84] : memref<32x128xf32, #tpu.memory_space<vmem>>, vector<1x128xf32>
    %226 = arith.index_cast %223 : i32 to index
    %c0_85 = arith.constant 0 : index
    %227 = vector.load %arg5[%226, %c0_85] : memref<48x128xf32, #tpu.memory_space<vmem>>, vector<1x128xf32>
    %228 = arith.addf %225, %227 : vector<1x128xf32>
    %229 = arith.addf %228, %0 : vector<1x128xf32>
    %cst_86 = arith.constant 0.000000e+00 : f32
    %230 = vector.broadcast %cst_86 : f32 to vector<1x128xf32>
    %231 = arith.maximumf %229, %230 : vector<1x128xf32>
    %232 = arith.addf %219, %231 : vector<1x128xf32>
    %233 = arith.index_cast %218 : i32 to index
    %c1_87 = arith.constant 1 : index
    %234 = memref.load %arg1[%233, %c1_87] : memref<8x8xi32, #tpu.memory_space<smem>>
    %235 = arith.index_cast %218 : i32 to index
    %c1_88 = arith.constant 1 : index
    %236 = memref.load %arg2[%235, %c1_88] : memref<8x8xi32, #tpu.memory_space<smem>>
    %237 = arith.index_cast %234 : i32 to index
    %c0_89 = arith.constant 0 : index
    %238 = vector.load %arg4[%237, %c0_89] : memref<32x128xf32, #tpu.memory_space<vmem>>, vector<1x128xf32>
    %239 = arith.index_cast %236 : i32 to index
    %c0_90 = arith.constant 0 : index
    %240 = vector.load %arg5[%239, %c0_90] : memref<48x128xf32, #tpu.memory_space<vmem>>, vector<1x128xf32>
    %241 = arith.addf %238, %240 : vector<1x128xf32>
    %242 = arith.addf %241, %0 : vector<1x128xf32>
    %cst_91 = arith.constant 0.000000e+00 : f32
    %243 = vector.broadcast %cst_91 : f32 to vector<1x128xf32>
    %244 = arith.maximumf %242, %243 : vector<1x128xf32>
    %245 = arith.addf %232, %244 : vector<1x128xf32>
    %246 = arith.index_cast %218 : i32 to index
    %c2_92 = arith.constant 2 : index
    %247 = memref.load %arg1[%246, %c2_92] : memref<8x8xi32, #tpu.memory_space<smem>>
    %248 = arith.index_cast %218 : i32 to index
    %c2_93 = arith.constant 2 : index
    %249 = memref.load %arg2[%248, %c2_93] : memref<8x8xi32, #tpu.memory_space<smem>>
    %250 = arith.index_cast %247 : i32 to index
    %c0_94 = arith.constant 0 : index
    %251 = vector.load %arg4[%250, %c0_94] : memref<32x128xf32, #tpu.memory_space<vmem>>, vector<1x128xf32>
    %252 = arith.index_cast %249 : i32 to index
    %c0_95 = arith.constant 0 : index
    %253 = vector.load %arg5[%252, %c0_95] : memref<48x128xf32, #tpu.memory_space<vmem>>, vector<1x128xf32>
    %254 = arith.addf %251, %253 : vector<1x128xf32>
    %255 = arith.addf %254, %0 : vector<1x128xf32>
    %cst_96 = arith.constant 0.000000e+00 : f32
    %256 = vector.broadcast %cst_96 : f32 to vector<1x128xf32>
    %257 = arith.maximumf %255, %256 : vector<1x128xf32>
    %258 = arith.addf %245, %257 : vector<1x128xf32>
    %259 = arith.index_cast %218 : i32 to index
    %c3_97 = arith.constant 3 : index
    %260 = memref.load %arg1[%259, %c3_97] : memref<8x8xi32, #tpu.memory_space<smem>>
    %261 = arith.index_cast %218 : i32 to index
    %c3_98 = arith.constant 3 : index
    %262 = memref.load %arg2[%261, %c3_98] : memref<8x8xi32, #tpu.memory_space<smem>>
    %263 = arith.index_cast %260 : i32 to index
    %c0_99 = arith.constant 0 : index
    %264 = vector.load %arg4[%263, %c0_99] : memref<32x128xf32, #tpu.memory_space<vmem>>, vector<1x128xf32>
    %265 = arith.index_cast %262 : i32 to index
    %c0_100 = arith.constant 0 : index
    %266 = vector.load %arg5[%265, %c0_100] : memref<48x128xf32, #tpu.memory_space<vmem>>, vector<1x128xf32>
    %267 = arith.addf %264, %266 : vector<1x128xf32>
    %268 = arith.addf %267, %0 : vector<1x128xf32>
    %cst_101 = arith.constant 0.000000e+00 : f32
    %269 = vector.broadcast %cst_101 : f32 to vector<1x128xf32>
    %270 = arith.maximumf %268, %269 : vector<1x128xf32>
    %271 = arith.addf %258, %270 : vector<1x128xf32>
    %272 = arith.index_cast %218 : i32 to index
    %c4_102 = arith.constant 4 : index
    %273 = memref.load %arg1[%272, %c4_102] : memref<8x8xi32, #tpu.memory_space<smem>>
    %274 = arith.index_cast %218 : i32 to index
    %c4_103 = arith.constant 4 : index
    %275 = memref.load %arg2[%274, %c4_103] : memref<8x8xi32, #tpu.memory_space<smem>>
    %276 = arith.index_cast %273 : i32 to index
    %c0_104 = arith.constant 0 : index
    %277 = vector.load %arg4[%276, %c0_104] : memref<32x128xf32, #tpu.memory_space<vmem>>, vector<1x128xf32>
    %278 = arith.index_cast %275 : i32 to index
    %c0_105 = arith.constant 0 : index
    %279 = vector.load %arg5[%278, %c0_105] : memref<48x128xf32, #tpu.memory_space<vmem>>, vector<1x128xf32>
    %280 = arith.addf %277, %279 : vector<1x128xf32>
    %281 = arith.addf %280, %0 : vector<1x128xf32>
    %cst_106 = arith.constant 0.000000e+00 : f32
    %282 = vector.broadcast %cst_106 : f32 to vector<1x128xf32>
    %283 = arith.maximumf %281, %282 : vector<1x128xf32>
    %284 = arith.addf %271, %283 : vector<1x128xf32>
    %285 = arith.index_cast %218 : i32 to index
    %c5_107 = arith.constant 5 : index
    %286 = memref.load %arg1[%285, %c5_107] : memref<8x8xi32, #tpu.memory_space<smem>>
    %287 = arith.index_cast %218 : i32 to index
    %c5_108 = arith.constant 5 : index
    %288 = memref.load %arg2[%287, %c5_108] : memref<8x8xi32, #tpu.memory_space<smem>>
    %289 = arith.index_cast %286 : i32 to index
    %c0_109 = arith.constant 0 : index
    %290 = vector.load %arg4[%289, %c0_109] : memref<32x128xf32, #tpu.memory_space<vmem>>, vector<1x128xf32>
    %291 = arith.index_cast %288 : i32 to index
    %c0_110 = arith.constant 0 : index
    %292 = vector.load %arg5[%291, %c0_110] : memref<48x128xf32, #tpu.memory_space<vmem>>, vector<1x128xf32>
    %293 = arith.addf %290, %292 : vector<1x128xf32>
    %294 = arith.addf %293, %0 : vector<1x128xf32>
    %cst_111 = arith.constant 0.000000e+00 : f32
    %295 = vector.broadcast %cst_111 : f32 to vector<1x128xf32>
    %296 = arith.maximumf %294, %295 : vector<1x128xf32>
    %297 = arith.addf %284, %296 : vector<1x128xf32>
    %298 = arith.index_cast %218 : i32 to index
    %c6_112 = arith.constant 6 : index
    %299 = memref.load %arg1[%298, %c6_112] : memref<8x8xi32, #tpu.memory_space<smem>>
    %300 = arith.index_cast %218 : i32 to index
    %c6_113 = arith.constant 6 : index
    %301 = memref.load %arg2[%300, %c6_113] : memref<8x8xi32, #tpu.memory_space<smem>>
    %302 = arith.index_cast %299 : i32 to index
    %c0_114 = arith.constant 0 : index
    %303 = vector.load %arg4[%302, %c0_114] : memref<32x128xf32, #tpu.memory_space<vmem>>, vector<1x128xf32>
    %304 = arith.index_cast %301 : i32 to index
    %c0_115 = arith.constant 0 : index
    %305 = vector.load %arg5[%304, %c0_115] : memref<48x128xf32, #tpu.memory_space<vmem>>, vector<1x128xf32>
    %306 = arith.addf %303, %305 : vector<1x128xf32>
    %307 = arith.addf %306, %0 : vector<1x128xf32>
    %cst_116 = arith.constant 0.000000e+00 : f32
    %308 = vector.broadcast %cst_116 : f32 to vector<1x128xf32>
    %309 = arith.maximumf %307, %308 : vector<1x128xf32>
    %310 = arith.addf %297, %309 : vector<1x128xf32>
    %311 = arith.index_cast %218 : i32 to index
    %c7_117 = arith.constant 7 : index
    %312 = memref.load %arg1[%311, %c7_117] : memref<8x8xi32, #tpu.memory_space<smem>>
    %313 = arith.index_cast %218 : i32 to index
    %c7_118 = arith.constant 7 : index
    %314 = memref.load %arg2[%313, %c7_118] : memref<8x8xi32, #tpu.memory_space<smem>>
    %315 = arith.index_cast %312 : i32 to index
    %c0_119 = arith.constant 0 : index
    %316 = vector.load %arg4[%315, %c0_119] : memref<32x128xf32, #tpu.memory_space<vmem>>, vector<1x128xf32>
    %317 = arith.index_cast %314 : i32 to index
    %c0_120 = arith.constant 0 : index
    %318 = vector.load %arg5[%317, %c0_120] : memref<48x128xf32, #tpu.memory_space<vmem>>, vector<1x128xf32>
    %319 = arith.addf %316, %318 : vector<1x128xf32>
    %320 = arith.addf %319, %0 : vector<1x128xf32>
    %cst_121 = arith.constant 0.000000e+00 : f32
    %321 = vector.broadcast %cst_121 : f32 to vector<1x128xf32>
    %322 = arith.maximumf %320, %321 : vector<1x128xf32>
    %323 = arith.addf %310, %322 : vector<1x128xf32>
    %c2_122 = arith.constant 2 : index
    %c0_123 = arith.constant 0 : index
    %324 = vector.load %arg10[%c2_122, %c0_123] : memref<8x128xf32, #tpu.memory_space<vmem>>, vector<1x128xf32>
    tpu.vector_store %arg10[%c2_122, %c0_123], %323 {strides = array<i32>} : memref<8x128xf32, #tpu.memory_space<vmem>>, vector<1x128xf32>,
    %c8_i32_124 = arith.constant 8 : i32
    %325 = arith.muli %arg0, %c8_i32_124 : i32
    %c3_i32 = arith.constant 3 : i32
    %326 = arith.addi %325, %c3_i32 : i32
    %cst_125 = arith.constant 0.000000e+00 : f32
    %327 = vector.broadcast %cst_125 : f32 to vector<1x128xf32>
    %328 = arith.index_cast %326 : i32 to index
    %c0_126 = arith.constant 0 : index
    %329 = memref.load %arg1[%328, %c0_126] : memref<8x8xi32, #tpu.memory_space<smem>>
    %330 = arith.index_cast %326 : i32 to index
    %c0_127 = arith.constant 0 : index
    %331 = memref.load %arg2[%330, %c0_127] : memref<8x8xi32, #tpu.memory_space<smem>>
    %332 = arith.index_cast %329 : i32 to index
    %c0_128 = arith.constant 0 : index
    %333 = vector.load %arg4[%332, %c0_128] : memref<32x128xf32, #tpu.memory_space<vmem>>, vector<1x128xf32>
    %334 = arith.index_cast %331 : i32 to index
    %c0_129 = arith.constant 0 : index
    %335 = vector.load %arg5[%334, %c0_129] : memref<48x128xf32, #tpu.memory_space<vmem>>, vector<1x128xf32>
    %336 = arith.addf %333, %335 : vector<1x128xf32>
    %337 = arith.addf %336, %0 : vector<1x128xf32>
    %cst_130 = arith.constant 0.000000e+00 : f32
    %338 = vector.broadcast %cst_130 : f32 to vector<1x128xf32>
    %339 = arith.maximumf %337, %338 : vector<1x128xf32>
    %340 = arith.addf %327, %339 : vector<1x128xf32>
    %341 = arith.index_cast %326 : i32 to index
    %c1_131 = arith.constant 1 : index
    %342 = memref.load %arg1[%341, %c1_131] : memref<8x8xi32, #tpu.memory_space<smem>>
    %343 = arith.index_cast %326 : i32 to index
    %c1_132 = arith.constant 1 : index
    %344 = memref.load %arg2[%343, %c1_132] : memref<8x8xi32, #tpu.memory_space<smem>>
    %345 = arith.index_cast %342 : i32 to index
    %c0_133 = arith.constant 0 : index
    %346 = vector.load %arg4[%345, %c0_133] : memref<32x128xf32, #tpu.memory_space<vmem>>, vector<1x128xf32>
    %347 = arith.index_cast %344 : i32 to index
    %c0_134 = arith.constant 0 : index
    %348 = vector.load %arg5[%347, %c0_134] : memref<48x128xf32, #tpu.memory_space<vmem>>, vector<1x128xf32>
    %349 = arith.addf %346, %348 : vector<1x128xf32>
    %350 = arith.addf %349, %0 : vector<1x128xf32>
    %cst_135 = arith.constant 0.000000e+00 : f32
    %351 = vector.broadcast %cst_135 : f32 to vector<1x128xf32>
    %352 = arith.maximumf %350, %351 : vector<1x128xf32>
    %353 = arith.addf %340, %352 : vector<1x128xf32>
    %354 = arith.index_cast %326 : i32 to index
    %c2_136 = arith.constant 2 : index
    %355 = memref.load %arg1[%354, %c2_136] : memref<8x8xi32, #tpu.memory_space<smem>>
    %356 = arith.index_cast %326 : i32 to index
    %c2_137 = arith.constant 2 : index
    %357 = memref.load %arg2[%356, %c2_137] : memref<8x8xi32, #tpu.memory_space<smem>>
    %358 = arith.index_cast %355 : i32 to index
    %c0_138 = arith.constant 0 : index
    %359 = vector.load %arg4[%358, %c0_138] : memref<32x128xf32, #tpu.memory_space<vmem>>, vector<1x128xf32>
    %360 = arith.index_cast %357 : i32 to index
    %c0_139 = arith.constant 0 : index
    %361 = vector.load %arg5[%360, %c0_139] : memref<48x128xf32, #tpu.memory_space<vmem>>, vector<1x128xf32>
    %362 = arith.addf %359, %361 : vector<1x128xf32>
    %363 = arith.addf %362, %0 : vector<1x128xf32>
    %cst_140 = arith.constant 0.000000e+00 : f32
    %364 = vector.broadcast %cst_140 : f32 to vector<1x128xf32>
    %365 = arith.maximumf %363, %364 : vector<1x128xf32>
    %366 = arith.addf %353, %365 : vector<1x128xf32>
    %367 = arith.index_cast %326 : i32 to index
    %c3_141 = arith.constant 3 : index
    %368 = memref.load %arg1[%367, %c3_141] : memref<8x8xi32, #tpu.memory_space<smem>>
    %369 = arith.index_cast %326 : i32 to index
    %c3_142 = arith.constant 3 : index
    %370 = memref.load %arg2[%369, %c3_142] : memref<8x8xi32, #tpu.memory_space<smem>>
    %371 = arith.index_cast %368 : i32 to index
    %c0_143 = arith.constant 0 : index
    %372 = vector.load %arg4[%371, %c0_143] : memref<32x128xf32, #tpu.memory_space<vmem>>, vector<1x128xf32>
    %373 = arith.index_cast %370 : i32 to index
    %c0_144 = arith.constant 0 : index
    %374 = vector.load %arg5[%373, %c0_144] : memref<48x128xf32, #tpu.memory_space<vmem>>, vector<1x128xf32>
    %375 = arith.addf %372, %374 : vector<1x128xf32>
    %376 = arith.addf %375, %0 : vector<1x128xf32>
    %cst_145 = arith.constant 0.000000e+00 : f32
    %377 = vector.broadcast %cst_145 : f32 to vector<1x128xf32>
    %378 = arith.maximumf %376, %377 : vector<1x128xf32>
    %379 = arith.addf %366, %378 : vector<1x128xf32>
    %380 = arith.index_cast %326 : i32 to index
    %c4_146 = arith.constant 4 : index
    %381 = memref.load %arg1[%380, %c4_146] : memref<8x8xi32, #tpu.memory_space<smem>>
    %382 = arith.index_cast %326 : i32 to index
    %c4_147 = arith.constant 4 : index
    %383 = memref.load %arg2[%382, %c4_147] : memref<8x8xi32, #tpu.memory_space<smem>>
    %384 = arith.index_cast %381 : i32 to index
    %c0_148 = arith.constant 0 : index
    %385 = vector.load %arg4[%384, %c0_148] : memref<32x128xf32, #tpu.memory_space<vmem>>, vector<1x128xf32>
    %386 = arith.index_cast %383 : i32 to index
    %c0_149 = arith.constant 0 : index
    %387 = vector.load %arg5[%386, %c0_149] : memref<48x128xf32, #tpu.memory_space<vmem>>, vector<1x128xf32>
    %388 = arith.addf %385, %387 : vector<1x128xf32>
    %389 = arith.addf %388, %0 : vector<1x128xf32>
    %cst_150 = arith.constant 0.000000e+00 : f32
    %390 = vector.broadcast %cst_150 : f32 to vector<1x128xf32>
    %391 = arith.maximumf %389, %390 : vector<1x128xf32>
    %392 = arith.addf %379, %391 : vector<1x128xf32>
    %393 = arith.index_cast %326 : i32 to index
    %c5_151 = arith.constant 5 : index
    %394 = memref.load %arg1[%393, %c5_151] : memref<8x8xi32, #tpu.memory_space<smem>>
    %395 = arith.index_cast %326 : i32 to index
    %c5_152 = arith.constant 5 : index
    %396 = memref.load %arg2[%395, %c5_152] : memref<8x8xi32, #tpu.memory_space<smem>>
    %397 = arith.index_cast %394 : i32 to index
    %c0_153 = arith.constant 0 : index
    %398 = vector.load %arg4[%397, %c0_153] : memref<32x128xf32, #tpu.memory_space<vmem>>, vector<1x128xf32>
    %399 = arith.index_cast %396 : i32 to index
    %c0_154 = arith.constant 0 : index
    %400 = vector.load %arg5[%399, %c0_154] : memref<48x128xf32, #tpu.memory_space<vmem>>, vector<1x128xf32>
    %401 = arith.addf %398, %400 : vector<1x128xf32>
    %402 = arith.addf %401, %0 : vector<1x128xf32>
    %cst_155 = arith.constant 0.000000e+00 : f32
    %403 = vector.broadcast %cst_155 : f32 to vector<1x128xf32>
    %404 = arith.maximumf %402, %403 : vector<1x128xf32>
    %405 = arith.addf %392, %404 : vector<1x128xf32>
    %406 = arith.index_cast %326 : i32 to index
    %c6_156 = arith.constant 6 : index
    %407 = memref.load %arg1[%406, %c6_156] : memref<8x8xi32, #tpu.memory_space<smem>>
    %408 = arith.index_cast %326 : i32 to index
    %c6_157 = arith.constant 6 : index
    %409 = memref.load %arg2[%408, %c6_157] : memref<8x8xi32, #tpu.memory_space<smem>>
    %410 = arith.index_cast %407 : i32 to index
    %c0_158 = arith.constant 0 : index
    %411 = vector.load %arg4[%410, %c0_158] : memref<32x128xf32, #tpu.memory_space<vmem>>, vector<1x128xf32>
    %412 = arith.index_cast %409 : i32 to index
    %c0_159 = arith.constant 0 : index
    %413 = vector.load %arg5[%412, %c0_159] : memref<48x128xf32, #tpu.memory_space<vmem>>, vector<1x128xf32>
    %414 = arith.addf %411, %413 : vector<1x128xf32>
    %415 = arith.addf %414, %0 : vector<1x128xf32>
    %cst_160 = arith.constant 0.000000e+00 : f32
    %416 = vector.broadcast %cst_160 : f32 to vector<1x128xf32>
    %417 = arith.maximumf %415, %416 : vector<1x128xf32>
    %418 = arith.addf %405, %417 : vector<1x128xf32>
    %419 = arith.index_cast %326 : i32 to index
    %c7_161 = arith.constant 7 : index
    %420 = memref.load %arg1[%419, %c7_161] : memref<8x8xi32, #tpu.memory_space<smem>>
    %421 = arith.index_cast %326 : i32 to index
    %c7_162 = arith.constant 7 : index
    %422 = memref.load %arg2[%421, %c7_162] : memref<8x8xi32, #tpu.memory_space<smem>>
    %423 = arith.index_cast %420 : i32 to index
    %c0_163 = arith.constant 0 : index
    %424 = vector.load %arg4[%423, %c0_163] : memref<32x128xf32, #tpu.memory_space<vmem>>, vector<1x128xf32>
    %425 = arith.index_cast %422 : i32 to index
    %c0_164 = arith.constant 0 : index
    %426 = vector.load %arg5[%425, %c0_164] : memref<48x128xf32, #tpu.memory_space<vmem>>, vector<1x128xf32>
    %427 = arith.addf %424, %426 : vector<1x128xf32>
    %428 = arith.addf %427, %0 : vector<1x128xf32>
    %cst_165 = arith.constant 0.000000e+00 : f32
    %429 = vector.broadcast %cst_165 : f32 to vector<1x128xf32>
    %430 = arith.maximumf %428, %429 : vector<1x128xf32>
    %431 = arith.addf %418, %430 : vector<1x128xf32>
    %c3_166 = arith.constant 3 : index
    %c0_167 = arith.constant 0 : index
    %432 = vector.load %arg10[%c3_166, %c0_167] : memref<8x128xf32, #tpu.memory_space<vmem>>, vector<1x128xf32>
    tpu.vector_store %arg10[%c3_166, %c0_167], %431 {strides = array<i32>} : memref<8x128xf32, #tpu.memory_space<vmem>>, vector<1x128xf32>,
    %c8_i32_168 = arith.constant 8 : i32
    %433 = arith.muli %arg0, %c8_i32_168 : i32
    %c4_i32 = arith.constant 4 : i32
    %434 = arith.addi %433, %c4_i32 : i32
    %cst_169 = arith.constant 0.000000e+00 : f32
    %435 = vector.broadcast %cst_169 : f32 to vector<1x128xf32>
    %436 = arith.index_cast %434 : i32 to index
    %c0_170 = arith.constant 0 : index
    %437 = memref.load %arg1[%436, %c0_170] : memref<8x8xi32, #tpu.memory_space<smem>>
    %438 = arith.index_cast %434 : i32 to index
    %c0_171 = arith.constant 0 : index
    %439 = memref.load %arg2[%438, %c0_171] : memref<8x8xi32, #tpu.memory_space<smem>>
    %440 = arith.index_cast %437 : i32 to index
    %c0_172 = arith.constant 0 : index
    %441 = vector.load %arg4[%440, %c0_172] : memref<32x128xf32, #tpu.memory_space<vmem>>, vector<1x128xf32>
    %442 = arith.index_cast %439 : i32 to index
    %c0_173 = arith.constant 0 : index
    %443 = vector.load %arg5[%442, %c0_173] : memref<48x128xf32, #tpu.memory_space<vmem>>, vector<1x128xf32>
    %444 = arith.addf %441, %443 : vector<1x128xf32>
    %445 = arith.addf %444, %0 : vector<1x128xf32>
    %cst_174 = arith.constant 0.000000e+00 : f32
    %446 = vector.broadcast %cst_174 : f32 to vector<1x128xf32>
    %447 = arith.maximumf %445, %446 : vector<1x128xf32>
    %448 = arith.addf %435, %447 : vector<1x128xf32>
    %449 = arith.index_cast %434 : i32 to index
    %c1_175 = arith.constant 1 : index
    %450 = memref.load %arg1[%449, %c1_175] : memref<8x8xi32, #tpu.memory_space<smem>>
    %451 = arith.index_cast %434 : i32 to index
    %c1_176 = arith.constant 1 : index
    %452 = memref.load %arg2[%451, %c1_176] : memref<8x8xi32, #tpu.memory_space<smem>>
    %453 = arith.index_cast %450 : i32 to index
    %c0_177 = arith.constant 0 : index
    %454 = vector.load %arg4[%453, %c0_177] : memref<32x128xf32, #tpu.memory_space<vmem>>, vector<1x128xf32>
    %455 = arith.index_cast %452 : i32 to index
    %c0_178 = arith.constant 0 : index
    %456 = vector.load %arg5[%455, %c0_178] : memref<48x128xf32, #tpu.memory_space<vmem>>, vector<1x128xf32>
    %457 = arith.addf %454, %456 : vector<1x128xf32>
    %458 = arith.addf %457, %0 : vector<1x128xf32>
    %cst_179 = arith.constant 0.000000e+00 : f32
    %459 = vector.broadcast %cst_179 : f32 to vector<1x128xf32>
    %460 = arith.maximumf %458, %459 : vector<1x128xf32>
    %461 = arith.addf %448, %460 : vector<1x128xf32>
    %462 = arith.index_cast %434 : i32 to index
    %c2_180 = arith.constant 2 : index
    %463 = memref.load %arg1[%462, %c2_180] : memref<8x8xi32, #tpu.memory_space<smem>>
    %464 = arith.index_cast %434 : i32 to index
    %c2_181 = arith.constant 2 : index
    %465 = memref.load %arg2[%464, %c2_181] : memref<8x8xi32, #tpu.memory_space<smem>>
    %466 = arith.index_cast %463 : i32 to index
    %c0_182 = arith.constant 0 : index
    %467 = vector.load %arg4[%466, %c0_182] : memref<32x128xf32, #tpu.memory_space<vmem>>, vector<1x128xf32>
    %468 = arith.index_cast %465 : i32 to index
    %c0_183 = arith.constant 0 : index
    %469 = vector.load %arg5[%468, %c0_183] : memref<48x128xf32, #tpu.memory_space<vmem>>, vector<1x128xf32>
    %470 = arith.addf %467, %469 : vector<1x128xf32>
    %471 = arith.addf %470, %0 : vector<1x128xf32>
    %cst_184 = arith.constant 0.000000e+00 : f32
    %472 = vector.broadcast %cst_184 : f32 to vector<1x128xf32>
    %473 = arith.maximumf %471, %472 : vector<1x128xf32>
    %474 = arith.addf %461, %473 : vector<1x128xf32>
    %475 = arith.index_cast %434 : i32 to index
    %c3_185 = arith.constant 3 : index
    %476 = memref.load %arg1[%475, %c3_185] : memref<8x8xi32, #tpu.memory_space<smem>>
    %477 = arith.index_cast %434 : i32 to index
    %c3_186 = arith.constant 3 : index
    %478 = memref.load %arg2[%477, %c3_186] : memref<8x8xi32, #tpu.memory_space<smem>>
    %479 = arith.index_cast %476 : i32 to index
    %c0_187 = arith.constant 0 : index
    %480 = vector.load %arg4[%479, %c0_187] : memref<32x128xf32, #tpu.memory_space<vmem>>, vector<1x128xf32>
    %481 = arith.index_cast %478 : i32 to index
    %c0_188 = arith.constant 0 : index
    %482 = vector.load %arg5[%481, %c0_188] : memref<48x128xf32, #tpu.memory_space<vmem>>, vector<1x128xf32>
    %483 = arith.addf %480, %482 : vector<1x128xf32>
    %484 = arith.addf %483, %0 : vector<1x128xf32>
    %cst_189 = arith.constant 0.000000e+00 : f32
    %485 = vector.broadcast %cst_189 : f32 to vector<1x128xf32>
    %486 = arith.maximumf %484, %485 : vector<1x128xf32>
    %487 = arith.addf %474, %486 : vector<1x128xf32>
    %488 = arith.index_cast %434 : i32 to index
    %c4_190 = arith.constant 4 : index
    %489 = memref.load %arg1[%488, %c4_190] : memref<8x8xi32, #tpu.memory_space<smem>>
    %490 = arith.index_cast %434 : i32 to index
    %c4_191 = arith.constant 4 : index
    %491 = memref.load %arg2[%490, %c4_191] : memref<8x8xi32, #tpu.memory_space<smem>>
    %492 = arith.index_cast %489 : i32 to index
    %c0_192 = arith.constant 0 : index
    %493 = vector.load %arg4[%492, %c0_192] : memref<32x128xf32, #tpu.memory_space<vmem>>, vector<1x128xf32>
    %494 = arith.index_cast %491 : i32 to index
    %c0_193 = arith.constant 0 : index
    %495 = vector.load %arg5[%494, %c0_193] : memref<48x128xf32, #tpu.memory_space<vmem>>, vector<1x128xf32>
    %496 = arith.addf %493, %495 : vector<1x128xf32>
    %497 = arith.addf %496, %0 : vector<1x128xf32>
    %cst_194 = arith.constant 0.000000e+00 : f32
    %498 = vector.broadcast %cst_194 : f32 to vector<1x128xf32>
    %499 = arith.maximumf %497, %498 : vector<1x128xf32>
    %500 = arith.addf %487, %499 : vector<1x128xf32>
    %501 = arith.index_cast %434 : i32 to index
    %c5_195 = arith.constant 5 : index
    %502 = memref.load %arg1[%501, %c5_195] : memref<8x8xi32, #tpu.memory_space<smem>>
    %503 = arith.index_cast %434 : i32 to index
    %c5_196 = arith.constant 5 : index
    %504 = memref.load %arg2[%503, %c5_196] : memref<8x8xi32, #tpu.memory_space<smem>>
    %505 = arith.index_cast %502 : i32 to index
    %c0_197 = arith.constant 0 : index
    %506 = vector.load %arg4[%505, %c0_197] : memref<32x128xf32, #tpu.memory_space<vmem>>, vector<1x128xf32>
    %507 = arith.index_cast %504 : i32 to index
    %c0_198 = arith.constant 0 : index
    %508 = vector.load %arg5[%507, %c0_198] : memref<48x128xf32, #tpu.memory_space<vmem>>, vector<1x128xf32>
    %509 = arith.addf %506, %508 : vector<1x128xf32>
    %510 = arith.addf %509, %0 : vector<1x128xf32>
    %cst_199 = arith.constant 0.000000e+00 : f32
    %511 = vector.broadcast %cst_199 : f32 to vector<1x128xf32>
    %512 = arith.maximumf %510, %511 : vector<1x128xf32>
    %513 = arith.addf %500, %512 : vector<1x128xf32>
    %514 = arith.index_cast %434 : i32 to index
    %c6_200 = arith.constant 6 : index
    %515 = memref.load %arg1[%514, %c6_200] : memref<8x8xi32, #tpu.memory_space<smem>>
    %516 = arith.index_cast %434 : i32 to index
    %c6_201 = arith.constant 6 : index
    %517 = memref.load %arg2[%516, %c6_201] : memref<8x8xi32, #tpu.memory_space<smem>>
    %518 = arith.index_cast %515 : i32 to index
    %c0_202 = arith.constant 0 : index
    %519 = vector.load %arg4[%518, %c0_202] : memref<32x128xf32, #tpu.memory_space<vmem>>, vector<1x128xf32>
    %520 = arith.index_cast %517 : i32 to index
    %c0_203 = arith.constant 0 : index
    %521 = vector.load %arg5[%520, %c0_203] : memref<48x128xf32, #tpu.memory_space<vmem>>, vector<1x128xf32>
    %522 = arith.addf %519, %521 : vector<1x128xf32>
    %523 = arith.addf %522, %0 : vector<1x128xf32>
    %cst_204 = arith.constant 0.000000e+00 : f32
    %524 = vector.broadcast %cst_204 : f32 to vector<1x128xf32>
    %525 = arith.maximumf %523, %524 : vector<1x128xf32>
    %526 = arith.addf %513, %525 : vector<1x128xf32>
    %527 = arith.index_cast %434 : i32 to index
    %c7_205 = arith.constant 7 : index
    %528 = memref.load %arg1[%527, %c7_205] : memref<8x8xi32, #tpu.memory_space<smem>>
    %529 = arith.index_cast %434 : i32 to index
    %c7_206 = arith.constant 7 : index
    %530 = memref.load %arg2[%529, %c7_206] : memref<8x8xi32, #tpu.memory_space<smem>>
    %531 = arith.index_cast %528 : i32 to index
    %c0_207 = arith.constant 0 : index
    %532 = vector.load %arg4[%531, %c0_207] : memref<32x128xf32, #tpu.memory_space<vmem>>, vector<1x128xf32>
    %533 = arith.index_cast %530 : i32 to index
    %c0_208 = arith.constant 0 : index
    %534 = vector.load %arg5[%533, %c0_208] : memref<48x128xf32, #tpu.memory_space<vmem>>, vector<1x128xf32>
    %535 = arith.addf %532, %534 : vector<1x128xf32>
    %536 = arith.addf %535, %0 : vector<1x128xf32>
    %cst_209 = arith.constant 0.000000e+00 : f32
    %537 = vector.broadcast %cst_209 : f32 to vector<1x128xf32>
    %538 = arith.maximumf %536, %537 : vector<1x128xf32>
    %539 = arith.addf %526, %538 : vector<1x128xf32>
    %c4_210 = arith.constant 4 : index
    %c0_211 = arith.constant 0 : index
    %540 = vector.load %arg10[%c4_210, %c0_211] : memref<8x128xf32, #tpu.memory_space<vmem>>, vector<1x128xf32>
    tpu.vector_store %arg10[%c4_210, %c0_211], %539 {strides = array<i32>} : memref<8x128xf32, #tpu.memory_space<vmem>>, vector<1x128xf32>,
    %c8_i32_212 = arith.constant 8 : i32
    %541 = arith.muli %arg0, %c8_i32_212 : i32
    %c5_i32 = arith.constant 5 : i32
    %542 = arith.addi %541, %c5_i32 : i32
    %cst_213 = arith.constant 0.000000e+00 : f32
    %543 = vector.broadcast %cst_213 : f32 to vector<1x128xf32>
    %544 = arith.index_cast %542 : i32 to index
    %c0_214 = arith.constant 0 : index
    %545 = memref.load %arg1[%544, %c0_214] : memref<8x8xi32, #tpu.memory_space<smem>>
    %546 = arith.index_cast %542 : i32 to index
    %c0_215 = arith.constant 0 : index
    %547 = memref.load %arg2[%546, %c0_215] : memref<8x8xi32, #tpu.memory_space<smem>>
    %548 = arith.index_cast %545 : i32 to index
    %c0_216 = arith.constant 0 : index
    %549 = vector.load %arg4[%548, %c0_216] : memref<32x128xf32, #tpu.memory_space<vmem>>, vector<1x128xf32>
    %550 = arith.index_cast %547 : i32 to index
    %c0_217 = arith.constant 0 : index
    %551 = vector.load %arg5[%550, %c0_217] : memref<48x128xf32, #tpu.memory_space<vmem>>, vector<1x128xf32>
    %552 = arith.addf %549, %551 : vector<1x128xf32>
    %553 = arith.addf %552, %0 : vector<1x128xf32>
    %cst_218 = arith.constant 0.000000e+00 : f32
    %554 = vector.broadcast %cst_218 : f32 to vector<1x128xf32>
    %555 = arith.maximumf %553, %554 : vector<1x128xf32>
    %556 = arith.addf %543, %555 : vector<1x128xf32>
    %557 = arith.index_cast %542 : i32 to index
    %c1_219 = arith.constant 1 : index
    %558 = memref.load %arg1[%557, %c1_219] : memref<8x8xi32, #tpu.memory_space<smem>>
    %559 = arith.index_cast %542 : i32 to index
    %c1_220 = arith.constant 1 : index
    %560 = memref.load %arg2[%559, %c1_220] : memref<8x8xi32, #tpu.memory_space<smem>>
    %561 = arith.index_cast %558 : i32 to index
    %c0_221 = arith.constant 0 : index
    %562 = vector.load %arg4[%561, %c0_221] : memref<32x128xf32, #tpu.memory_space<vmem>>, vector<1x128xf32>
    %563 = arith.index_cast %560 : i32 to index
    %c0_222 = arith.constant 0 : index
    %564 = vector.load %arg5[%563, %c0_222] : memref<48x128xf32, #tpu.memory_space<vmem>>, vector<1x128xf32>
    %565 = arith.addf %562, %564 : vector<1x128xf32>
    %566 = arith.addf %565, %0 : vector<1x128xf32>
    %cst_223 = arith.constant 0.000000e+00 : f32
    %567 = vector.broadcast %cst_223 : f32 to vector<1x128xf32>
    %568 = arith.maximumf %566, %567 : vector<1x128xf32>
    %569 = arith.addf %556, %568 : vector<1x128xf32>
    %570 = arith.index_cast %542 : i32 to index
    %c2_224 = arith.constant 2 : index
    %571 = memref.load %arg1[%570, %c2_224] : memref<8x8xi32, #tpu.memory_space<smem>>
    %572 = arith.index_cast %542 : i32 to index
    %c2_225 = arith.constant 2 : index
    %573 = memref.load %arg2[%572, %c2_225] : memref<8x8xi32, #tpu.memory_space<smem>>
    %574 = arith.index_cast %571 : i32 to index
    %c0_226 = arith.constant 0 : index
    %575 = vector.load %arg4[%574, %c0_226] : memref<32x128xf32, #tpu.memory_space<vmem>>, vector<1x128xf32>
    %576 = arith.index_cast %573 : i32 to index
    %c0_227 = arith.constant 0 : index
    %577 = vector.load %arg5[%576, %c0_227] : memref<48x128xf32, #tpu.memory_space<vmem>>, vector<1x128xf32>
    %578 = arith.addf %575, %577 : vector<1x128xf32>
    %579 = arith.addf %578, %0 : vector<1x128xf32>
    %cst_228 = arith.constant 0.000000e+00 : f32
    %580 = vector.broadcast %cst_228 : f32 to vector<1x128xf32>
    %581 = arith.maximumf %579, %580 : vector<1x128xf32>
    %582 = arith.addf %569, %581 : vector<1x128xf32>
    %583 = arith.index_cast %542 : i32 to index
    %c3_229 = arith.constant 3 : index
    %584 = memref.load %arg1[%583, %c3_229] : memref<8x8xi32, #tpu.memory_space<smem>>
    %585 = arith.index_cast %542 : i32 to index
    %c3_230 = arith.constant 3 : index
    %586 = memref.load %arg2[%585, %c3_230] : memref<8x8xi32, #tpu.memory_space<smem>>
    %587 = arith.index_cast %584 : i32 to index
    %c0_231 = arith.constant 0 : index
    %588 = vector.load %arg4[%587, %c0_231] : memref<32x128xf32, #tpu.memory_space<vmem>>, vector<1x128xf32>
    %589 = arith.index_cast %586 : i32 to index
    %c0_232 = arith.constant 0 : index
    %590 = vector.load %arg5[%589, %c0_232] : memref<48x128xf32, #tpu.memory_space<vmem>>, vector<1x128xf32>
    %591 = arith.addf %588, %590 : vector<1x128xf32>
    %592 = arith.addf %591, %0 : vector<1x128xf32>
    %cst_233 = arith.constant 0.000000e+00 : f32
    %593 = vector.broadcast %cst_233 : f32 to vector<1x128xf32>
    %594 = arith.maximumf %592, %593 : vector<1x128xf32>
    %595 = arith.addf %582, %594 : vector<1x128xf32>
    %596 = arith.index_cast %542 : i32 to index
    %c4_234 = arith.constant 4 : index
    %597 = memref.load %arg1[%596, %c4_234] : memref<8x8xi32, #tpu.memory_space<smem>>
    %598 = arith.index_cast %542 : i32 to index
    %c4_235 = arith.constant 4 : index
    %599 = memref.load %arg2[%598, %c4_235] : memref<8x8xi32, #tpu.memory_space<smem>>
    %600 = arith.index_cast %597 : i32 to index
    %c0_236 = arith.constant 0 : index
    %601 = vector.load %arg4[%600, %c0_236] : memref<32x128xf32, #tpu.memory_space<vmem>>, vector<1x128xf32>
    %602 = arith.index_cast %599 : i32 to index
    %c0_237 = arith.constant 0 : index
    %603 = vector.load %arg5[%602, %c0_237] : memref<48x128xf32, #tpu.memory_space<vmem>>, vector<1x128xf32>
    %604 = arith.addf %601, %603 : vector<1x128xf32>
    %605 = arith.addf %604, %0 : vector<1x128xf32>
    %cst_238 = arith.constant 0.000000e+00 : f32
    %606 = vector.broadcast %cst_238 : f32 to vector<1x128xf32>
    %607 = arith.maximumf %605, %606 : vector<1x128xf32>
    %608 = arith.addf %595, %607 : vector<1x128xf32>
    %609 = arith.index_cast %542 : i32 to index
    %c5_239 = arith.constant 5 : index
    %610 = memref.load %arg1[%609, %c5_239] : memref<8x8xi32, #tpu.memory_space<smem>>
    %611 = arith.index_cast %542 : i32 to index
    %c5_240 = arith.constant 5 : index
    %612 = memref.load %arg2[%611, %c5_240] : memref<8x8xi32, #tpu.memory_space<smem>>
    %613 = arith.index_cast %610 : i32 to index
    %c0_241 = arith.constant 0 : index
    %614 = vector.load %arg4[%613, %c0_241] : memref<32x128xf32, #tpu.memory_space<vmem>>, vector<1x128xf32>
    %615 = arith.index_cast %612 : i32 to index
    %c0_242 = arith.constant 0 : index
    %616 = vector.load %arg5[%615, %c0_242] : memref<48x128xf32, #tpu.memory_space<vmem>>, vector<1x128xf32>
    %617 = arith.addf %614, %616 : vector<1x128xf32>
    %618 = arith.addf %617, %0 : vector<1x128xf32>
    %cst_243 = arith.constant 0.000000e+00 : f32
    %619 = vector.broadcast %cst_243 : f32 to vector<1x128xf32>
    %620 = arith.maximumf %618, %619 : vector<1x128xf32>
    %621 = arith.addf %608, %620 : vector<1x128xf32>
    %622 = arith.index_cast %542 : i32 to index
    %c6_244 = arith.constant 6 : index
    %623 = memref.load %arg1[%622, %c6_244] : memref<8x8xi32, #tpu.memory_space<smem>>
    %624 = arith.index_cast %542 : i32 to index
    %c6_245 = arith.constant 6 : index
    %625 = memref.load %arg2[%624, %c6_245] : memref<8x8xi32, #tpu.memory_space<smem>>
    %626 = arith.index_cast %623 : i32 to index
    %c0_246 = arith.constant 0 : index
    %627 = vector.load %arg4[%626, %c0_246] : memref<32x128xf32, #tpu.memory_space<vmem>>, vector<1x128xf32>
    %628 = arith.index_cast %625 : i32 to index
    %c0_247 = arith.constant 0 : index
    %629 = vector.load %arg5[%628, %c0_247] : memref<48x128xf32, #tpu.memory_space<vmem>>, vector<1x128xf32>
    %630 = arith.addf %627, %629 : vector<1x128xf32>
    %631 = arith.addf %630, %0 : vector<1x128xf32>
    %cst_248 = arith.constant 0.000000e+00 : f32
    %632 = vector.broadcast %cst_248 : f32 to vector<1x128xf32>
    %633 = arith.maximumf %631, %632 : vector<1x128xf32>
    %634 = arith.addf %621, %633 : vector<1x128xf32>
    %635 = arith.index_cast %542 : i32 to index
    %c7_249 = arith.constant 7 : index
    %636 = memref.load %arg1[%635, %c7_249] : memref<8x8xi32, #tpu.memory_space<smem>>
    %637 = arith.index_cast %542 : i32 to index
    %c7_250 = arith.constant 7 : index
    %638 = memref.load %arg2[%637, %c7_250] : memref<8x8xi32, #tpu.memory_space<smem>>
    %639 = arith.index_cast %636 : i32 to index
    %c0_251 = arith.constant 0 : index
    %640 = vector.load %arg4[%639, %c0_251] : memref<32x128xf32, #tpu.memory_space<vmem>>, vector<1x128xf32>
    %641 = arith.index_cast %638 : i32 to index
    %c0_252 = arith.constant 0 : index
    %642 = vector.load %arg5[%641, %c0_252] : memref<48x128xf32, #tpu.memory_space<vmem>>, vector<1x128xf32>
    %643 = arith.addf %640, %642 : vector<1x128xf32>
    %644 = arith.addf %643, %0 : vector<1x128xf32>
    %cst_253 = arith.constant 0.000000e+00 : f32
    %645 = vector.broadcast %cst_253 : f32 to vector<1x128xf32>
    %646 = arith.maximumf %644, %645 : vector<1x128xf32>
    %647 = arith.addf %634, %646 : vector<1x128xf32>
    %c5_254 = arith.constant 5 : index
    %c0_255 = arith.constant 0 : index
    %648 = vector.load %arg10[%c5_254, %c0_255] : memref<8x128xf32, #tpu.memory_space<vmem>>, vector<1x128xf32>
    tpu.vector_store %arg10[%c5_254, %c0_255], %647 {strides = array<i32>} : memref<8x128xf32, #tpu.memory_space<vmem>>, vector<1x128xf32>,
    %c8_i32_256 = arith.constant 8 : i32
    %649 = arith.muli %arg0, %c8_i32_256 : i32
    %c6_i32 = arith.constant 6 : i32
    %650 = arith.addi %649, %c6_i32 : i32
    %cst_257 = arith.constant 0.000000e+00 : f32
    %651 = vector.broadcast %cst_257 : f32 to vector<1x128xf32>
    %652 = arith.index_cast %650 : i32 to index
    %c0_258 = arith.constant 0 : index
    %653 = memref.load %arg1[%652, %c0_258] : memref<8x8xi32, #tpu.memory_space<smem>>
    %654 = arith.index_cast %650 : i32 to index
    %c0_259 = arith.constant 0 : index
    %655 = memref.load %arg2[%654, %c0_259] : memref<8x8xi32, #tpu.memory_space<smem>>
    %656 = arith.index_cast %653 : i32 to index
    %c0_260 = arith.constant 0 : index
    %657 = vector.load %arg4[%656, %c0_260] : memref<32x128xf32, #tpu.memory_space<vmem>>, vector<1x128xf32>
    %658 = arith.index_cast %655 : i32 to index
    %c0_261 = arith.constant 0 : index
    %659 = vector.load %arg5[%658, %c0_261] : memref<48x128xf32, #tpu.memory_space<vmem>>, vector<1x128xf32>
    %660 = arith.addf %657, %659 : vector<1x128xf32>
    %661 = arith.addf %660, %0 : vector<1x128xf32>
    %cst_262 = arith.constant 0.000000e+00 : f32
    %662 = vector.broadcast %cst_262 : f32 to vector<1x128xf32>
    %663 = arith.maximumf %661, %662 : vector<1x128xf32>
    %664 = arith.addf %651, %663 : vector<1x128xf32>
    %665 = arith.index_cast %650 : i32 to index
    %c1_263 = arith.constant 1 : index
    %666 = memref.load %arg1[%665, %c1_263] : memref<8x8xi32, #tpu.memory_space<smem>>
    %667 = arith.index_cast %650 : i32 to index
    %c1_264 = arith.constant 1 : index
    %668 = memref.load %arg2[%667, %c1_264] : memref<8x8xi32, #tpu.memory_space<smem>>
    %669 = arith.index_cast %666 : i32 to index
    %c0_265 = arith.constant 0 : index
    %670 = vector.load %arg4[%669, %c0_265] : memref<32x128xf32, #tpu.memory_space<vmem>>, vector<1x128xf32>
    %671 = arith.index_cast %668 : i32 to index
    %c0_266 = arith.constant 0 : index
    %672 = vector.load %arg5[%671, %c0_266] : memref<48x128xf32, #tpu.memory_space<vmem>>, vector<1x128xf32>
    %673 = arith.addf %670, %672 : vector<1x128xf32>
    %674 = arith.addf %673, %0 : vector<1x128xf32>
    %cst_267 = arith.constant 0.000000e+00 : f32
    %675 = vector.broadcast %cst_267 : f32 to vector<1x128xf32>
    %676 = arith.maximumf %674, %675 : vector<1x128xf32>
    %677 = arith.addf %664, %676 : vector<1x128xf32>
    %678 = arith.index_cast %650 : i32 to index
    %c2_268 = arith.constant 2 : index
    %679 = memref.load %arg1[%678, %c2_268] : memref<8x8xi32, #tpu.memory_space<smem>>
    %680 = arith.index_cast %650 : i32 to index
    %c2_269 = arith.constant 2 : index
    %681 = memref.load %arg2[%680, %c2_269] : memref<8x8xi32, #tpu.memory_space<smem>>
    %682 = arith.index_cast %679 : i32 to index
    %c0_270 = arith.constant 0 : index
    %683 = vector.load %arg4[%682, %c0_270] : memref<32x128xf32, #tpu.memory_space<vmem>>, vector<1x128xf32>
    %684 = arith.index_cast %681 : i32 to index
    %c0_271 = arith.constant 0 : index
    %685 = vector.load %arg5[%684, %c0_271] : memref<48x128xf32, #tpu.memory_space<vmem>>, vector<1x128xf32>
    %686 = arith.addf %683, %685 : vector<1x128xf32>
    %687 = arith.addf %686, %0 : vector<1x128xf32>
    %cst_272 = arith.constant 0.000000e+00 : f32
    %688 = vector.broadcast %cst_272 : f32 to vector<1x128xf32>
    %689 = arith.maximumf %687, %688 : vector<1x128xf32>
    %690 = arith.addf %677, %689 : vector<1x128xf32>
    %691 = arith.index_cast %650 : i32 to index
    %c3_273 = arith.constant 3 : index
    %692 = memref.load %arg1[%691, %c3_273] : memref<8x8xi32, #tpu.memory_space<smem>>
    %693 = arith.index_cast %650 : i32 to index
    %c3_274 = arith.constant 3 : index
    %694 = memref.load %arg2[%693, %c3_274] : memref<8x8xi32, #tpu.memory_space<smem>>
    %695 = arith.index_cast %692 : i32 to index
    %c0_275 = arith.constant 0 : index
    %696 = vector.load %arg4[%695, %c0_275] : memref<32x128xf32, #tpu.memory_space<vmem>>, vector<1x128xf32>
    %697 = arith.index_cast %694 : i32 to index
    %c0_276 = arith.constant 0 : index
    %698 = vector.load %arg5[%697, %c0_276] : memref<48x128xf32, #tpu.memory_space<vmem>>, vector<1x128xf32>
    %699 = arith.addf %696, %698 : vector<1x128xf32>
    %700 = arith.addf %699, %0 : vector<1x128xf32>
    %cst_277 = arith.constant 0.000000e+00 : f32
    %701 = vector.broadcast %cst_277 : f32 to vector<1x128xf32>
    %702 = arith.maximumf %700, %701 : vector<1x128xf32>
    %703 = arith.addf %690, %702 : vector<1x128xf32>
    %704 = arith.index_cast %650 : i32 to index
    %c4_278 = arith.constant 4 : index
    %705 = memref.load %arg1[%704, %c4_278] : memref<8x8xi32, #tpu.memory_space<smem>>
    %706 = arith.index_cast %650 : i32 to index
    %c4_279 = arith.constant 4 : index
    %707 = memref.load %arg2[%706, %c4_279] : memref<8x8xi32, #tpu.memory_space<smem>>
    %708 = arith.index_cast %705 : i32 to index
    %c0_280 = arith.constant 0 : index
    %709 = vector.load %arg4[%708, %c0_280] : memref<32x128xf32, #tpu.memory_space<vmem>>, vector<1x128xf32>
    %710 = arith.index_cast %707 : i32 to index
    %c0_281 = arith.constant 0 : index
    %711 = vector.load %arg5[%710, %c0_281] : memref<48x128xf32, #tpu.memory_space<vmem>>, vector<1x128xf32>
    %712 = arith.addf %709, %711 : vector<1x128xf32>
    %713 = arith.addf %712, %0 : vector<1x128xf32>
    %cst_282 = arith.constant 0.000000e+00 : f32
    %714 = vector.broadcast %cst_282 : f32 to vector<1x128xf32>
    %715 = arith.maximumf %713, %714 : vector<1x128xf32>
    %716 = arith.addf %703, %715 : vector<1x128xf32>
    %717 = arith.index_cast %650 : i32 to index
    %c5_283 = arith.constant 5 : index
    %718 = memref.load %arg1[%717, %c5_283] : memref<8x8xi32, #tpu.memory_space<smem>>
    %719 = arith.index_cast %650 : i32 to index
    %c5_284 = arith.constant 5 : index
    %720 = memref.load %arg2[%719, %c5_284] : memref<8x8xi32, #tpu.memory_space<smem>>
    %721 = arith.index_cast %718 : i32 to index
    %c0_285 = arith.constant 0 : index
    %722 = vector.load %arg4[%721, %c0_285] : memref<32x128xf32, #tpu.memory_space<vmem>>, vector<1x128xf32>
    %723 = arith.index_cast %720 : i32 to index
    %c0_286 = arith.constant 0 : index
    %724 = vector.load %arg5[%723, %c0_286] : memref<48x128xf32, #tpu.memory_space<vmem>>, vector<1x128xf32>
    %725 = arith.addf %722, %724 : vector<1x128xf32>
    %726 = arith.addf %725, %0 : vector<1x128xf32>
    %cst_287 = arith.constant 0.000000e+00 : f32
    %727 = vector.broadcast %cst_287 : f32 to vector<1x128xf32>
    %728 = arith.maximumf %726, %727 : vector<1x128xf32>
    %729 = arith.addf %716, %728 : vector<1x128xf32>
    %730 = arith.index_cast %650 : i32 to index
    %c6_288 = arith.constant 6 : index
    %731 = memref.load %arg1[%730, %c6_288] : memref<8x8xi32, #tpu.memory_space<smem>>
    %732 = arith.index_cast %650 : i32 to index
    %c6_289 = arith.constant 6 : index
    %733 = memref.load %arg2[%732, %c6_289] : memref<8x8xi32, #tpu.memory_space<smem>>
    %734 = arith.index_cast %731 : i32 to index
    %c0_290 = arith.constant 0 : index
    %735 = vector.load %arg4[%734, %c0_290] : memref<32x128xf32, #tpu.memory_space<vmem>>, vector<1x128xf32>
    %736 = arith.index_cast %733 : i32 to index
    %c0_291 = arith.constant 0 : index
    %737 = vector.load %arg5[%736, %c0_291] : memref<48x128xf32, #tpu.memory_space<vmem>>, vector<1x128xf32>
    %738 = arith.addf %735, %737 : vector<1x128xf32>
    %739 = arith.addf %738, %0 : vector<1x128xf32>
    %cst_292 = arith.constant 0.000000e+00 : f32
    %740 = vector.broadcast %cst_292 : f32 to vector<1x128xf32>
    %741 = arith.maximumf %739, %740 : vector<1x128xf32>
    %742 = arith.addf %729, %741 : vector<1x128xf32>
    %743 = arith.index_cast %650 : i32 to index
    %c7_293 = arith.constant 7 : index
    %744 = memref.load %arg1[%743, %c7_293] : memref<8x8xi32, #tpu.memory_space<smem>>
    %745 = arith.index_cast %650 : i32 to index
    %c7_294 = arith.constant 7 : index
    %746 = memref.load %arg2[%745, %c7_294] : memref<8x8xi32, #tpu.memory_space<smem>>
    %747 = arith.index_cast %744 : i32 to index
    %c0_295 = arith.constant 0 : index
    %748 = vector.load %arg4[%747, %c0_295] : memref<32x128xf32, #tpu.memory_space<vmem>>, vector<1x128xf32>
    %749 = arith.index_cast %746 : i32 to index
    %c0_296 = arith.constant 0 : index
    %750 = vector.load %arg5[%749, %c0_296] : memref<48x128xf32, #tpu.memory_space<vmem>>, vector<1x128xf32>
    %751 = arith.addf %748, %750 : vector<1x128xf32>
    %752 = arith.addf %751, %0 : vector<1x128xf32>
    %cst_297 = arith.constant 0.000000e+00 : f32
    %753 = vector.broadcast %cst_297 : f32 to vector<1x128xf32>
    %754 = arith.maximumf %752, %753 : vector<1x128xf32>
    %755 = arith.addf %742, %754 : vector<1x128xf32>
    %c6_298 = arith.constant 6 : index
    %c0_299 = arith.constant 0 : index
    %756 = vector.load %arg10[%c6_298, %c0_299] : memref<8x128xf32, #tpu.memory_space<vmem>>, vector<1x128xf32>
    tpu.vector_store %arg10[%c6_298, %c0_299], %755 {strides = array<i32>} : memref<8x128xf32, #tpu.memory_space<vmem>>, vector<1x128xf32>,
    %c8_i32_300 = arith.constant 8 : i32
    %757 = arith.muli %arg0, %c8_i32_300 : i32
    %c7_i32 = arith.constant 7 : i32
    %758 = arith.addi %757, %c7_i32 : i32
    %cst_301 = arith.constant 0.000000e+00 : f32
    %759 = vector.broadcast %cst_301 : f32 to vector<1x128xf32>
    %760 = arith.index_cast %758 : i32 to index
    %c0_302 = arith.constant 0 : index
    %761 = memref.load %arg1[%760, %c0_302] : memref<8x8xi32, #tpu.memory_space<smem>>
    %762 = arith.index_cast %758 : i32 to index
    %c0_303 = arith.constant 0 : index
    %763 = memref.load %arg2[%762, %c0_303] : memref<8x8xi32, #tpu.memory_space<smem>>
    %764 = arith.index_cast %761 : i32 to index
    %c0_304 = arith.constant 0 : index
    %765 = vector.load %arg4[%764, %c0_304] : memref<32x128xf32, #tpu.memory_space<vmem>>, vector<1x128xf32>
    %766 = arith.index_cast %763 : i32 to index
    %c0_305 = arith.constant 0 : index
    %767 = vector.load %arg5[%766, %c0_305] : memref<48x128xf32, #tpu.memory_space<vmem>>, vector<1x128xf32>
    %768 = arith.addf %765, %767 : vector<1x128xf32>
    %769 = arith.addf %768, %0 : vector<1x128xf32>
    %cst_306 = arith.constant 0.000000e+00 : f32
    %770 = vector.broadcast %cst_306 : f32 to vector<1x128xf32>
    %771 = arith.maximumf %769, %770 : vector<1x128xf32>
    %772 = arith.addf %759, %771 : vector<1x128xf32>
    %773 = arith.index_cast %758 : i32 to index
    %c1_307 = arith.constant 1 : index
    %774 = memref.load %arg1[%773, %c1_307] : memref<8x8xi32, #tpu.memory_space<smem>>
    %775 = arith.index_cast %758 : i32 to index
    %c1_308 = arith.constant 1 : index
    %776 = memref.load %arg2[%775, %c1_308] : memref<8x8xi32, #tpu.memory_space<smem>>
    %777 = arith.index_cast %774 : i32 to index
    %c0_309 = arith.constant 0 : index
    %778 = vector.load %arg4[%777, %c0_309] : memref<32x128xf32, #tpu.memory_space<vmem>>, vector<1x128xf32>
    %779 = arith.index_cast %776 : i32 to index
    %c0_310 = arith.constant 0 : index
    %780 = vector.load %arg5[%779, %c0_310] : memref<48x128xf32, #tpu.memory_space<vmem>>, vector<1x128xf32>
    %781 = arith.addf %778, %780 : vector<1x128xf32>
    %782 = arith.addf %781, %0 : vector<1x128xf32>
    %cst_311 = arith.constant 0.000000e+00 : f32
    %783 = vector.broadcast %cst_311 : f32 to vector<1x128xf32>
    %784 = arith.maximumf %782, %783 : vector<1x128xf32>
    %785 = arith.addf %772, %784 : vector<1x128xf32>
    %786 = arith.index_cast %758 : i32 to index
    %c2_312 = arith.constant 2 : index
    %787 = memref.load %arg1[%786, %c2_312] : memref<8x8xi32, #tpu.memory_space<smem>>
    %788 = arith.index_cast %758 : i32 to index
    %c2_313 = arith.constant 2 : index
    %789 = memref.load %arg2[%788, %c2_313] : memref<8x8xi32, #tpu.memory_space<smem>>
    %790 = arith.index_cast %787 : i32 to index
    %c0_314 = arith.constant 0 : index
    %791 = vector.load %arg4[%790, %c0_314] : memref<32x128xf32, #tpu.memory_space<vmem>>, vector<1x128xf32>
    %792 = arith.index_cast %789 : i32 to index
    %c0_315 = arith.constant 0 : index
    %793 = vector.load %arg5[%792, %c0_315] : memref<48x128xf32, #tpu.memory_space<vmem>>, vector<1x128xf32>
    %794 = arith.addf %791, %793 : vector<1x128xf32>
    %795 = arith.addf %794, %0 : vector<1x128xf32>
    %cst_316 = arith.constant 0.000000e+00 : f32
    %796 = vector.broadcast %cst_316 : f32 to vector<1x128xf32>
    %797 = arith.maximumf %795, %796 : vector<1x128xf32>
    %798 = arith.addf %785, %797 : vector<1x128xf32>
    %799 = arith.index_cast %758 : i32 to index
    %c3_317 = arith.constant 3 : index
    %800 = memref.load %arg1[%799, %c3_317] : memref<8x8xi32, #tpu.memory_space<smem>>
    %801 = arith.index_cast %758 : i32 to index
    %c3_318 = arith.constant 3 : index
    %802 = memref.load %arg2[%801, %c3_318] : memref<8x8xi32, #tpu.memory_space<smem>>
    %803 = arith.index_cast %800 : i32 to index
    %c0_319 = arith.constant 0 : index
    %804 = vector.load %arg4[%803, %c0_319] : memref<32x128xf32, #tpu.memory_space<vmem>>, vector<1x128xf32>
    %805 = arith.index_cast %802 : i32 to index
    %c0_320 = arith.constant 0 : index
    %806 = vector.load %arg5[%805, %c0_320] : memref<48x128xf32, #tpu.memory_space<vmem>>, vector<1x128xf32>
    %807 = arith.addf %804, %806 : vector<1x128xf32>
    %808 = arith.addf %807, %0 : vector<1x128xf32>
    %cst_321 = arith.constant 0.000000e+00 : f32
    %809 = vector.broadcast %cst_321 : f32 to vector<1x128xf32>
    %810 = arith.maximumf %808, %809 : vector<1x128xf32>
    %811 = arith.addf %798, %810 : vector<1x128xf32>
    %812 = arith.index_cast %758 : i32 to index
    %c4_322 = arith.constant 4 : index
    %813 = memref.load %arg1[%812, %c4_322] : memref<8x8xi32, #tpu.memory_space<smem>>
    %814 = arith.index_cast %758 : i32 to index
    %c4_323 = arith.constant 4 : index
    %815 = memref.load %arg2[%814, %c4_323] : memref<8x8xi32, #tpu.memory_space<smem>>
    %816 = arith.index_cast %813 : i32 to index
    %c0_324 = arith.constant 0 : index
    %817 = vector.load %arg4[%816, %c0_324] : memref<32x128xf32, #tpu.memory_space<vmem>>, vector<1x128xf32>
    %818 = arith.index_cast %815 : i32 to index
    %c0_325 = arith.constant 0 : index
    %819 = vector.load %arg5[%818, %c0_325] : memref<48x128xf32, #tpu.memory_space<vmem>>, vector<1x128xf32>
    %820 = arith.addf %817, %819 : vector<1x128xf32>
    %821 = arith.addf %820, %0 : vector<1x128xf32>
    %cst_326 = arith.constant 0.000000e+00 : f32
    %822 = vector.broadcast %cst_326 : f32 to vector<1x128xf32>
    %823 = arith.maximumf %821, %822 : vector<1x128xf32>
    %824 = arith.addf %811, %823 : vector<1x128xf32>
    %825 = arith.index_cast %758 : i32 to index
    %c5_327 = arith.constant 5 : index
    %826 = memref.load %arg1[%825, %c5_327] : memref<8x8xi32, #tpu.memory_space<smem>>
    %827 = arith.index_cast %758 : i32 to index
    %c5_328 = arith.constant 5 : index
    %828 = memref.load %arg2[%827, %c5_328] : memref<8x8xi32, #tpu.memory_space<smem>>
    %829 = arith.index_cast %826 : i32 to index
    %c0_329 = arith.constant 0 : index
    %830 = vector.load %arg4[%829, %c0_329] : memref<32x128xf32, #tpu.memory_space<vmem>>, vector<1x128xf32>
    %831 = arith.index_cast %828 : i32 to index
    %c0_330 = arith.constant 0 : index
    %832 = vector.load %arg5[%831, %c0_330] : memref<48x128xf32, #tpu.memory_space<vmem>>, vector<1x128xf32>
    %833 = arith.addf %830, %832 : vector<1x128xf32>
    %834 = arith.addf %833, %0 : vector<1x128xf32>
    %cst_331 = arith.constant 0.000000e+00 : f32
    %835 = vector.broadcast %cst_331 : f32 to vector<1x128xf32>
    %836 = arith.maximumf %834, %835 : vector<1x128xf32>
    %837 = arith.addf %824, %836 : vector<1x128xf32>
    %838 = arith.index_cast %758 : i32 to index
    %c6_332 = arith.constant 6 : index
    %839 = memref.load %arg1[%838, %c6_332] : memref<8x8xi32, #tpu.memory_space<smem>>
    %840 = arith.index_cast %758 : i32 to index
    %c6_333 = arith.constant 6 : index
    %841 = memref.load %arg2[%840, %c6_333] : memref<8x8xi32, #tpu.memory_space<smem>>
    %842 = arith.index_cast %839 : i32 to index
    %c0_334 = arith.constant 0 : index
    %843 = vector.load %arg4[%842, %c0_334] : memref<32x128xf32, #tpu.memory_space<vmem>>, vector<1x128xf32>
    %844 = arith.index_cast %841 : i32 to index
    %c0_335 = arith.constant 0 : index
    %845 = vector.load %arg5[%844, %c0_335] : memref<48x128xf32, #tpu.memory_space<vmem>>, vector<1x128xf32>
    %846 = arith.addf %843, %845 : vector<1x128xf32>
    %847 = arith.addf %846, %0 : vector<1x128xf32>
    %cst_336 = arith.constant 0.000000e+00 : f32
    %848 = vector.broadcast %cst_336 : f32 to vector<1x128xf32>
    %849 = arith.maximumf %847, %848 : vector<1x128xf32>
    %850 = arith.addf %837, %849 : vector<1x128xf32>
    %851 = arith.index_cast %758 : i32 to index
    %c7_337 = arith.constant 7 : index
    %852 = memref.load %arg1[%851, %c7_337] : memref<8x8xi32, #tpu.memory_space<smem>>
    %853 = arith.index_cast %758 : i32 to index
    %c7_338 = arith.constant 7 : index
    %854 = memref.load %arg2[%853, %c7_338] : memref<8x8xi32, #tpu.memory_space<smem>>
    %855 = arith.index_cast %852 : i32 to index
    %c0_339 = arith.constant 0 : index
    %856 = vector.load %arg4[%855, %c0_339] : memref<32x128xf32, #tpu.memory_space<vmem>>, vector<1x128xf32>
    %857 = arith.index_cast %854 : i32 to index
    %c0_340 = arith.constant 0 : index
    %858 = vector.load %arg5[%857, %c0_340] : memref<48x128xf32, #tpu.memory_space<vmem>>, vector<1x128xf32>
    %859 = arith.addf %856, %858 : vector<1x128xf32>
    %860 = arith.addf %859, %0 : vector<1x128xf32>
    %cst_341 = arith.constant 0.000000e+00 : f32
    %861 = vector.broadcast %cst_341 : f32 to vector<1x128xf32>
    %862 = arith.maximumf %860, %861 : vector<1x128xf32>
    %863 = arith.addf %850, %862 : vector<1x128xf32>
    %c7_342 = arith.constant 7 : index
    %c0_343 = arith.constant 0 : index
    %864 = vector.load %arg10[%c7_342, %c0_343] : memref<8x128xf32, #tpu.memory_space<vmem>>, vector<1x128xf32>
    tpu.vector_store %arg10[%c7_342, %c0_343], %863 {strides = array<i32>} : memref<8x128xf32, #tpu.memory_space<vmem>>, vector<1x128xf32>,
    %c0_344 = arith.constant 0 : index
    %c0_345 = arith.constant 0 : index
    %865 = vector.load %arg3[%c0_344, %c0_345] : memref<8x8xf32, #tpu.memory_space<vmem>>, vector<8x8xf32>
    %cst_346 = arith.constant dense<0.000000e+00> : vector<8xf32>
    %866 = vector.multi_reduction <add>, %865, %cst_346 [1] : vector<8x8xf32> to vector<8xf32>
    %867 = vector.shape_cast %866 : vector<8xf32> to vector<8x1xf32>
    %cst_347 = arith.constant 1.000000e+00 : f32
    %868 = vector.broadcast %cst_347 : f32 to vector<8x1xf32>
    %869 = arith.maximumf %867, %868 : vector<8x1xf32>
    %c0_348 = arith.constant 0 : index
    %c0_349 = arith.constant 0 : index
    %870 = vector.load %arg10[%c0_348, %c0_349] : memref<8x128xf32, #tpu.memory_space<vmem>>, vector<8x128xf32>
    %871 = tpu.reciprocal %869 : vector<8x1xf32> -> vector<8x1xf32>
    %872 = vector.broadcast %871 : vector<8x1xf32> to vector<8x128xf32>
    %873 = arith.mulf %870, %872 : vector<8x128xf32>
    %c0_350 = arith.constant 0 : index
    %c0_351 = arith.constant 0 : index
    %874 = vector.load %arg7[%c0_350, %c0_351] : memref<128x128xf32, #tpu.memory_space<vmem>>, vector<128x128xf32>
    %cst_352 = arith.constant dense<0.000000e+00> : vector<8x128xf32>
    %875 = tpu.matmul %873, %874, %cst_352 {dimension_numbers = #tpu.dot_dimension_numbers<[1], [0], [0], [1], [0, 0, 1, 1], [], []>} : vector<8x128xf32>, vector<128x128xf32>, vector<8x128xf32> -> vector<8x128xf32>
    %c0_353 = arith.constant 0 : index
    %c0_354 = arith.constant 0 : index
    %876 = vector.load %arg8[%c0_353, %c0_354] : memref<1x128xf32, #tpu.memory_space<vmem>>, vector<1x128xf32>
    %877 = vector.broadcast %876 : vector<1x128xf32> to vector<8x128xf32>
    %878 = arith.addf %875, %877 : vector<8x128xf32>
    %c0_355 = arith.constant 0 : index
    %c0_356 = arith.constant 0 : index
    %879 = vector.load %arg9[%c0_355, %c0_356] : memref<8x128xf32, #tpu.memory_space<vmem>>, vector<8x128xf32>
    tpu.vector_store %arg9[%c0_355, %c0_356], %878 {strides = array<i32>} : memref<8x128xf32, #tpu.memory_space<vmem>>, vector<8x128xf32>,
    return
  }
  func.func @transform_0(%arg0: i32, %arg1: memref<8x8xi32, #tpu.memory_space<smem>>, %arg2: memref<8x8xi32, #tpu.memory_space<smem>>) -> (i32, i32) {
    %c0_i32 = arith.constant 0 : i32
    %c0_i32_0 = arith.constant 0 : i32
    return %arg0, %c0_i32 : i32, i32
  }
  func.func @transform_1(%arg0: i32, %arg1: memref<8x8xi32, #tpu.memory_space<smem>>, %arg2: memref<8x8xi32, #tpu.memory_space<smem>>) -> (i32, i32) {
    %c0_i32 = arith.constant 0 : i32
    %c0_i32_0 = arith.constant 0 : i32
    %c0_i32_1 = arith.constant 0 : i32
    return %c0_i32, %c0_i32_0 : i32, i32
  }
  func.func @transform_2(%arg0: i32, %arg1: memref<8x8xi32, #tpu.memory_space<smem>>, %arg2: memref<8x8xi32, #tpu.memory_space<smem>>) -> (i32, i32) {
    %c0_i32 = arith.constant 0 : i32
    %c0_i32_0 = arith.constant 0 : i32
    %c0_i32_1 = arith.constant 0 : i32
    return %c0_i32, %c0_i32_0 : i32, i32
  }
  func.func @transform_3(%arg0: i32, %arg1: memref<8x8xi32, #tpu.memory_space<smem>>, %arg2: memref<8x8xi32, #tpu.memory_space<smem>>) -> (i32, i32) {
    %c0_i32 = arith.constant 0 : i32
    %c0_i32_0 = arith.constant 0 : i32
    %c0_i32_1 = arith.constant 0 : i32
    return %c0_i32, %c0_i32_0 : i32, i32
  }
  func.func @transform_4(%arg0: i32, %arg1: memref<8x8xi32, #tpu.memory_space<smem>>, %arg2: memref<8x8xi32, #tpu.memory_space<smem>>) -> (i32, i32) {
    %c0_i32 = arith.constant 0 : i32
    %c0_i32_0 = arith.constant 0 : i32
    %c0_i32_1 = arith.constant 0 : i32
    return %c0_i32, %c0_i32_0 : i32, i32
  }
  func.func @transform_5(%arg0: i32, %arg1: memref<8x8xi32, #tpu.memory_space<smem>>, %arg2: memref<8x8xi32, #tpu.memory_space<smem>>) -> (i32, i32) {
    %c0_i32 = arith.constant 0 : i32
    %c0_i32_0 = arith.constant 0 : i32
    %c0_i32_1 = arith.constant 0 : i32
    return %c0_i32, %c0_i32_0 : i32, i32
  }
  func.func @transform_6(%arg0: i32, %arg1: memref<8x8xi32, #tpu.memory_space<smem>>, %arg2: memref<8x8xi32, #tpu.memory_space<smem>>) -> (i32, i32) {
    %c0_i32 = arith.constant 0 : i32
    %c0_i32_0 = arith.constant 0 : i32
    return %arg0, %c0_i32 : i32, i32
  }
}

</mosaic_0001>

<bundles_post_ra>
// kernel: tpu_custom_call.1
= control target key start
LH: loop header
LB: loop body
LE: loop exit
PB: predicated region body
PF: predicated region fallthrough
CT: control target
= control target key end

     0   :  { %s1373_s27 = smov [#allocation4]   ;;  %s1374_s30 = smov [#allocation5]   ;;  %s1913_s0 = inlined_call_operand.hbm [shape: s32[8,8], index: 0, kind: input, shape index: {}]   ;;  %s1914_s2 = inlined_call_operand.hbm [shape: f32[8,8], index: 2, kind: input, shape index: {}]   ;;  %s1915_s3 = inlined_call_operand.hbm [shape: f32[32,128], index: 3, kind: input, shape index: {}]   ;;  %s1916_s4 = inlined_call_operand.hbm [shape: f32[48,128], index: 4, kind: input, shape index: {}]   ;;  %s1917_s5 = inlined_call_operand.vmem [shape: f32[1,128], index: 5, kind: input, shape index: {}]   ;;  %s1918_s6 = inlined_call_operand.hbm [shape: f32[128,128], index: 6, kind: input, shape index: {}]   ;;  %s1919_s7 = inlined_call_operand.vmem [shape: f32[1,128], index: 7, kind: input, shape index: {}]   ;;  %s1920_s8 = inlined_call_operand.hbm [shape: f32[8,128], index: 8, kind: output, shape index: {}]   ;;  %s1921_s1 = inlined_call_operand.hbm [shape: s32[8,8], index: 1, kind: input, shape index: {}]  }
   0x1   :  { %14 = dma.hbm_to_smem %s1913_s0, 128, %s1373_s27, [#allocation3] }
   0x2   :  { %16 = dma.hbm_to_smem %s1921_s1, 128, %s1374_s30, [#allocation3] }
   0x3   :  { %1363 = dma.done.wait [#allocation3], 256 }
   0x4   :  { %1364 = vsyncadd [#allocation3], 4294967040 }
   0x5   :  { %18 = sfence }
   0x6   :  { %19 = vsyncpa [#allocation7], 0 }
   0x7   :  { %20 = vsyncpa [#allocation10], 0 }
   0x8   :  { %21 = vsyncpa [#allocation13], 0 }
   0x9   :  { %22 = vsyncpa [#allocation8], 0  ;;  %s1375_s11 = smov [#allocation9]  }
   0xa   :  { %s38_s12 = sshll.u32 %s1375_s11, 4  ;;  %s39_s12 = int_to_ptr.vmem [resolvable:$true] %s38_s12 }
   0xb   :  { %s1271_s13 = scalar_lea.vmem %s39_s12, 512  ;;  %p1276_p1 = scmp.lt.s32.totalorder %s39_s12, %s39_s12 }
   0xc   :  { %p1272_p0 = scmp.ne.s32.totalorder %s39_s12, %s1271_s13  ;;  %p1277_p2 = scmp.lt.s32.totalorder %s1271_s13, %s1271_s13 }
   0xe   :  { %p1278_p3 = por %p1277_p2, %p1276_p1 }
  0x10   :  { %p1279_p4 = pnand %p1278_p3, %p1272_p0 }
  0x12   :  { %1282 = shalt.err (!%p1279_p4)
}
  0x13   :  { %s1376_s0 = smov 128   ;;  %s1377_s14 = smov 8  }
  0x14   :  { %44 = dma.hbm_to_vmem [thread:$0]  %s1915_s3, 512, %s39_s12, [#allocation10], %s1376_s0, %s1376_s0, %s1377_s14  }
  0x15   :  { %s1378_s16 = smov [#allocation6]   ;;  %s1379_s18 = smov [#allocation11]  }
  0x16   :  { %s29_s17 = sshll.u32 %s1378_s16, 4  ;;  %s50_s19 = sshll.u32 %s1379_s18, 4  ;;  %s30_s17 = int_to_ptr.vmem [resolvable:$true] %s29_s17  ;;  %s51_s19 = int_to_ptr.vmem [resolvable:$true] %s50_s19 }
  0x17   :  { %s1291_s20 = scalar_lea.vmem %s30_s17, 128  ;;  %p1296_p6 = scmp.lt.s32.totalorder %s30_s17, %s30_s17 }
  0x18   :  { %p1292_p5 = scmp.ne.s32.totalorder %s30_s17, %s1291_s20  ;;  %p1297_p7 = scmp.lt.s32.totalorder %s1291_s20, %s1291_s20 }
  0x1a   :  { %p1298_p8 = por %p1297_p7, %p1296_p6 }
  0x1c   :  { %p1299_p9 = pnand %p1298_p8, %p1292_p5 }
  0x1e   :  { %1302 = shalt.err (!%p1299_p9)
}
  0x1f   :  { %32 = dma.hbm_to_vmem [thread:$0]  %s1914_s2, 128, %s30_s17, [#allocation7]  }
  0x20   :  { %s1311_s23 = scalar_lea.vmem %s51_s19, 768  ;;  %p1316_p11 = scmp.lt.s32.totalorder %s51_s19, %s51_s19 }
  0x21   :  { %p1312_p10 = scmp.ne.s32.totalorder %s51_s19, %s1311_s23  ;;  %p1317_p12 = scmp.lt.s32.totalorder %s1311_s23, %s1311_s23 }
  0x23   :  { %p1318_p13 = por %p1317_p12, %p1316_p11 }
  0x25   :  { %p1319_p0 = pnand %p1318_p13, %p1312_p10 }
  0x27   :  { %1322 = shalt.err (!%p1319_p0)
}
  0x28   :  { %56 = dma.hbm_to_vmem [thread:$0]  %s1916_s4, 768, %s51_s19, [#allocation10], %s1376_s0, %s1376_s0, %s1377_s14  }
  0x29   :  { %s1380_s25 = smov [#allocation12]  }
  0x2a   :  { %s64_s26 = sshll.u32 %s1380_s25, 4  ;;  %s65_s26 = int_to_ptr.vmem [resolvable:$true] %s64_s26 }
  0x2b   :  { %s1331_s27 = scalar_lea.vmem %s65_s26, 2048  ;;  %p1336_p2 = scmp.lt.s32.totalorder %s65_s26, %s65_s26 }
  0x2c   :  { %p1332_p1 = scmp.ne.s32.totalorder %s65_s26, %s1331_s27  ;;  %p1337_p3 = scmp.lt.s32.totalorder %s1331_s27, %s1331_s27 }
  0x2e   :  { %p1338_p4 = por %p1337_p3, %p1336_p2 }
  0x30   :  { %p1339_p5 = pnand %p1338_p4, %p1332_p1 }
  0x32   :  { %1342 = shalt.err (!%p1339_p5)
}
  0x33   :  { %70 = dma.hbm_to_vmem [thread:$0]  %s1918_s6, 2048, %s65_s26, [#allocation13], %s1376_s0, %s1376_s0, %s1377_s14  }
  0x34   :  { %1365 = dma.done.wait [#allocation7], 128  }
  0x35   :  { %1366 = vsyncadd [#allocation7], 4294967168 }
  0x36   :  { %1367 = dma.done.wait [#allocation10], 1280  }
  0x37   :  { %1368 = vsyncadd [#allocation10], 4294966016 }
  0x38   :  { %1369 = dma.done.wait [#allocation13], 2048  }
  0x39   :  { %1370 = vsyncadd [#allocation13], 4294965248  ;;  %v1381_v0 = vmov 0.0   ;;  %s88_s4 = sld [smem:[#allocation4]]  ;;  %vm807_vm0 = vcmask 64512   ;;  %v806_v1 = vld [vmem:[#allocation6] sm:$0xff] }
  0x3a   :  { %1198 = vmatprep.subr.mxu0 %v1381_v0  ;;  %s89_s29 = sld [smem:[#allocation5]]  ;;  %v830_v2 = vld [vmem:[#allocation12 + $0x78] sm:$0xff]  ;;  %v829_v3 = vld [vmem:[#allocation12 + $0x70] sm:$0xff]  ;;  %v808_v4 = vsel %vm807_vm0, %v806_v1, 0.0  ;;  %v828_v5 = vld [vmem:[#allocation12 + $0x68] sm:$0xff]  ;;  %vm1382_vm1 = vmmov 0  }
  0x3b   :  { %s1054_s30 = sld [smem:[#allocation4 + $0x1]]  ;;  %1199 = vmatpush3.msra.mxu0 %v830_v2  ;;  %809 = vadd.xlane.f32.xlu0 %v808_v4  ;;  %v1465_v6 = vld [vmem:[%s1917_s5] sm:$0x1]  ;;  %v826_v15 = vld [vmem:[#allocation12 + $0x58] sm:$0xff]  ;;  %v825_v20 = vld [vmem:[#allocation12 + $0x50] sm:$0xff] }
  0x3c   :  { %s1055_s9 = sld [smem:[#allocation5 + $0x1]]  ;;  %1200 = vmatprep.subr.mxu0 %v1381_v0  ;;  %v827_v10 = vld [vmem:[#allocation12 + $0x60] sm:$0xff]  ;;  %v824_v25 = vld [vmem:[#allocation12 + $0x48] sm:$0xff]  ;;  %v822_v33 = vld [vmem:[#allocation12 + $0x38] sm:$0xff]  ;;  %1230 = vmatprep.mubr.msk.f32.mxu0 %vm1382_vm1, %v1381_v0 }
  0x3d   :  { %s1056_s10 = sld [smem:[#allocation4 + $0x2]]  ;;  %1201 = vmatpush3.msra.mxu0 %v829_v3  ;;  %v823_v29 = vld [vmem:[#allocation12 + $0x40] sm:$0xff]  ;;  %v821_v37 = vld [vmem:[#allocation12 + $0x30] sm:$0xff]  ;;  %v820_v44 = vld [vmem:[#allocation12 + $0x28] sm:$0xff] }
  0x3e   :  { %s1457_s11 = sld [smem:[#allocation5 + $0x2]]  ;;  %1202 = vmatprep.subr.mxu0 %v1381_v0  ;;  %v819_v51 = vld [vmem:[#allocation12 + $0x20] sm:$0xff]  ;;  %v818_v57 = vld [vmem:[#allocation12 + $0x18] sm:$0xff]  ;;  %v817_v63 = vld [vmem:[#allocation12 + $0x10] sm:$0xff] }
  0x3f   :  { %s1459_s6 = sld [smem:[#allocation4 + $0x3]]  ;;  %s90_s0 = scalar_lea.vmem [#allocation9], %s88_s4  ;;  %1203 = vmatpush3.msra.mxu0 %v828_v5  ;;  %v816_v3 = vld [vmem:[#allocation12 + $0x8] sm:$0xff] }
  0x40   :  { %v91_v7 = vld [vmem:[%s90_s0] sm:$0x1]  ;;  %s92_s14 = scalar_lea.vmem [#allocation11], %s89_s29  ;;  %s1468_s16 = sld [smem:[#allocation5 + $0x3]]  ;;  %1204 = vmatprep.subr.mxu0 %v1381_v0 }
  0x41   :  { %v93_v8 = vld [vmem:[%s92_s14] sm:$0x1]  ;;  %s101_s1 = scalar_lea.vmem [#allocation9], %s1054_s30  ;;  %s1470_s18 = sld [smem:[#allocation4 + $0x4]]  ;;  %1205 = vmatpush3.msra.mxu0 %v827_v10 }
  0x42   :  { %v102_v9 = vld [vmem:[%s101_s1] sm:$0x1]  ;;  %v94_v11 = vadd.f32 %v93_v8, %v91_v7  ;;  %s103_s15 = scalar_lea.vmem [#allocation11], %s1055_s9  ;;  %s1475_s20 = sld [smem:[#allocation5 + $0x4]]  ;;  %1206 = vmatprep.subr.mxu0 %v1381_v0 }
  0x43   :  { %v104_v12 = vld [vmem:[%s103_s15] sm:$0x1]  ;;  %s112_s17 = scalar_lea.vmem [#allocation9], %s1056_s10  ;;  %s1478_s21 = sld [smem:[#allocation4 + $0x5]]  ;;  %1207 = vmatpush3.msra.mxu0 %v826_v15 }
  0x44   :  { %v105_v13 = vadd.f32 %v104_v12, %v102_v9  ;;  %v113_v14 = vld [vmem:[%s112_s17] sm:$0x1]  ;;  %v95_v16 = vadd.f32 %v94_v11, %v1465_v6  ;;  %s114_s19 = scalar_lea.vmem [#allocation11], %s1457_s11  ;;  %s1481_s22 = sld [smem:[#allocation5 + $0x5]]  ;;  %1208 = vmatprep.subr.mxu0 %v1381_v0 }
  0x45   :  { %v115_v17 = vld [vmem:[%s114_s19] sm:$0x1]  ;;  %s123_s23 = scalar_lea.vmem [#allocation9], %s1459_s6  ;;  %s1485_s3 = sld [smem:[#allocation4 + $0x6]]  ;;  %1209 = vmatpush3.msra.mxu0 %v825_v20 }
  0x46   :  { %v106_v18 = vadd.f32 %v105_v13, %v1465_v6  ;;  %v116_v19 = vadd.f32 %v115_v17, %v113_v14  ;;  %v96_v21 = vmax.f32 %v95_v16, 0.0  ;;  %v124_v24 = vld [vmem:[%s123_s23] sm:$0x1]  ;;  %s1488_s24 = sld [smem:[#allocation5 + $0x6]]  ;;  %s125_s25 = scalar_lea.vmem [#allocation11], %s1468_s16  ;;  %1210 = vmatprep.subr.mxu0 %v1381_v0 }
  0x47   :  { %v126_v28 = vld [vmem:[%s125_s25] sm:$0x1]  ;;  %s1491_s26 = sld [smem:[#allocation4 + $0x7]]  ;;  %s134_s27 = scalar_lea.vmem [#allocation9], %s1470_s18  ;;  %1211 = vmatpush3.msra.mxu0 %v824_v25 }
  0x48   :  { %v107_v22 = vmax.f32 %v106_v18, 0.0  ;;  %v117_v23 = vadd.f32 %v116_v19, %v1465_v6  ;;  %v127_v30 = vadd.f32 %v126_v28, %v124_v24  ;;  %v135_v31 = vld [vmem:[%s134_s27] sm:$0x1]  ;;  %s1495_s2 = sld [smem:[#allocation5 + $0x7]]  ;;  %s136_s28 = scalar_lea.vmem [#allocation11], %s1475_s20  ;;  %1212 = vmatprep.subr.mxu0 %v1381_v0 }
  0x49   :  { %v137_v32 = vld [vmem:[%s136_s28] sm:$0x1]  ;;  %s1498_s4 = sld [smem:[#allocation4 + $0x80]]  ;;  %1213 = vmatpush3.msra.mxu0 %v823_v29  ;;  %s145_s30 = scalar_lea.vmem [#allocation9], %s1478_s21 }
  0x4a   :  { %v108_v26 = vadd.f32 %v107_v22, %v96_v21  ;;  %v118_v27 = vmax.f32 %v117_v23, 0.0  ;;  %v128_v35 = vadd.f32 %v127_v30, %v1465_v6  ;;  %v138_v36 = vadd.f32 %v137_v32, %v135_v31  ;;  %s1503_s29 = sld [smem:[#allocation5 + $0x80]]  ;;  %1214 = vmatprep.subr.mxu0 %v1381_v0  ;;  %v146_v40 = vld [vmem:[%s145_s30] sm:$0x1]  ;;  %s147_s9 = scalar_lea.vmem [#allocation11], %s1481_s22 }
  0x4b   :  { %1215 = vmatpush3.msra.mxu0 %v822_v33  ;;  %v148_v41 = vld [vmem:[%s147_s9] sm:$0x1]  ;;  %s156_s10 = scalar_lea.vmem [#allocation9], %s1485_s3  ;;  %s1070_s0 = sld [smem:[#allocation4 + $0x81]] }
  0x4c   :  { %v119_v34 = vadd.f32 %v118_v27, %v108_v26  ;;  %v129_v38 = vmax.f32 %v128_v35, 0.0  ;;  %v139_v39 = vadd.f32 %v138_v36, %v1465_v6  ;;  %v157_v42 = vld [vmem:[%s156_s10] sm:$0x1]  ;;  %s158_s11 = scalar_lea.vmem [#allocation11], %s1488_s24  ;;  %1216 = vmatprep.subr.mxu0 %v1381_v0  ;;  %v149_v47 = vadd.f32 %v148_v41, %v146_v40  ;;  %s1518_s14 = sld [smem:[#allocation5 + $0x81]] }
  0x4d   :  { %v159_v43 = vld [vmem:[%s158_s11] sm:$0x1]  ;;  %1217 = vmatpush3.msra.mxu0 %v821_v37  ;;  %s167_s6 = scalar_lea.vmem [#allocation9], %s1491_s26  ;;  %s1523_s15 = sld [smem:[#allocation4 + $0x82]] }
  0x4e   :  { %v130_v45 = vadd.f32 %v129_v38, %v119_v34  ;;  %v140_v46 = vmax.f32 %v139_v39, 0.0  ;;  %v160_v48 = vadd.f32 %v159_v43, %v157_v42  ;;  %v168_v49 = vld [vmem:[%s167_s6] sm:$0x1]  ;;  %s169_s12 = scalar_lea.vmem [#allocation11], %s1495_s2  ;;  %1218 = vmatprep.subr.mxu0 %v1381_v0  ;;  %v150_v53 = vadd.f32 %v149_v47, %v1465_v6  ;;  %s1525_s16 = sld [smem:[#allocation5 + $0x82]] }
  0x4f   :  { %v170_v50 = vld [vmem:[%s169_s12] sm:$0x1]  ;;  %s180_s13 = scalar_lea.vmem [#allocation9], %s1498_s4  ;;  %1219 = vmatpush3.msra.mxu0 %v820_v44  ;;  %s1528_s17 = sld [smem:[#allocation4 + $0x83]] }
  0x50   :  { %v141_v52 = vadd.f32 %v140_v46, %v130_v45  ;;  %v161_v54 = vadd.f32 %v160_v48, %v1465_v6  ;;  %v171_v55 = vadd.f32 %v170_v50, %v168_v49  ;;  %v181_v56 = vld [vmem:[%s180_s13] sm:$0x1]  ;;  %1220 = vmatprep.subr.mxu0 %v1381_v0  ;;  %v151_v58 = vmax.f32 %v150_v53, 0.0  ;;  %s182_s1 = scalar_lea.vmem [#allocation11], %s1503_s29  ;;  %s1530_s18 = sld [smem:[#allocation5 + $0x83]] }
  0x51   :  { %v183_v61 = vld [vmem:[%s182_s1] sm:$0x1]  ;;  %1221 = vmatpush3.msra.mxu0 %v819_v51  ;;  %s1533_s19 = sld [smem:[#allocation4 + $0x84]]  ;;  %s191_s20 = scalar_lea.vmem [#allocation9], %s1070_s0 }
  0x52   :  { %v162_v59 = vmax.f32 %v161_v54, 0.0  ;;  %v172_v60 = vadd.f32 %v171_v55, %v1465_v6  ;;  %v184_v62 = vadd.f32 %v183_v61, %v181_v56  ;;  %1222 = vmatprep.subr.mxu0 %v1381_v0  ;;  %v152_v1 = vadd.f32 %v151_v58, %v141_v52  ;;  %v192_v7 = vld [vmem:[%s191_s20] sm:$0x1]  ;;  %s1536_s21 = sld [smem:[#allocation5 + $0x84]]  ;;  %s193_s22 = scalar_lea.vmem [#allocation11], %s1518_s14 }
  0x53   :  { %1223 = vmatpush3.msra.mxu0 %v818_v57  ;;  %v815_v8 = vld [vmem:[#allocation12] sm:$0xff]  ;;  %s1540_s23 = sld [smem:[#allocation4 + $0x85]]  ;;  %s202_s3 = scalar_lea.vmem [#allocation9], %s1523_s15 }
  0x54   :  { %v173_v2 = vmax.f32 %v172_v60, 0.0  ;;  %1224 = vmatprep.subr.mxu0 %v1381_v0  ;;  %v163_v4 = vadd.f32 %v162_v59, %v152_v1  ;;  %v185_v5 = vadd.f32 %v184_v62, %v1465_v6  ;;  %v194_v10 = vld [vmem:[%s193_s22] sm:$0x1]  ;;  %s1543_s24 = sld [smem:[#allocation5 + $0x85]]  ;;  %s204_s25 = scalar_lea.vmem [#allocation11], %s1525_s16 }
  0x55   :  { %1225 = vmatpush3.msra.mxu0 %v817_v63  ;;  %v195_v11 = vadd.f32 %v194_v10, %v192_v7  ;;  %v203_v12 = vld [vmem:[%s202_s3] sm:$0x1]  ;;  %s1547_s26 = sld [smem:[#allocation4 + $0x86]]  ;;  %s213_s27 = scalar_lea.vmem [#allocation9], %s1528_s17 }
  0x56   :  { %1226 = vmatprep.subr.mxu0 %v1381_v0  ;;  %v174_v9 = vadd.f32 %v173_v2, %v163_v4  ;;  %v205_v13 = vld [vmem:[%s204_s25] sm:$0x1]  ;;  %v186_v14 = vmax.f32 %v185_v5, 0.0  ;;  %s1551_s2 = sld [smem:[#allocation5 + $0x86]]  ;;  %s215_s28 = scalar_lea.vmem [#allocation11], %s1530_s18 }
  0x57   :  { %1227 = vmatpush3.msra.mxu0 %v816_v3  ;;  %v196_v15 = vadd.f32 %v195_v11, %v1465_v6  ;;  %v206_v16 = vadd.f32 %v205_v13, %v203_v12  ;;  %v214_v17 = vld [vmem:[%s213_s27] sm:$0x1]  ;;  %s1554_s4 = sld [smem:[#allocation4 + $0x87]]  ;;  %s224_s29 = scalar_lea.vmem [#allocation9], %s1533_s19 }
  0x58   :  { %1228 = vmatprep.subr.mxu0 %v1381_v0  ;;  %175 = vst [vmem:[#allocation2] sm:$0x1] %v174_v9  ;;  %v216_v18 = vld [vmem:[%s215_s28] sm:$0x1]  ;;  %s1558_s30 = sld [smem:[#allocation5 + $0x87]]  ;;  %s226_s9 = scalar_lea.vmem [#allocation11], %s1536_s21 }
  0x59   :  { %1229 = vmatpush3.msra.mxu0 %v815_v8  ;;  %v197_v0 = vmax.f32 %v196_v15, 0.0  ;;  %v207_v19 = vadd.f32 %v206_v16, %v1465_v6  ;;  %v217_v20 = vadd.f32 %v216_v18, %v214_v17  ;;  %v225_v21 = vld [vmem:[%s224_s29] sm:$0x1]  ;;  %s1561_s10 = sld [smem:[#allocation4 + $0x100]]  ;;  %s235_s11 = scalar_lea.vmem [#allocation9], %s1540_s23 }
  0x5a   :  { %v227_v22 = vld [vmem:[%s226_s9] sm:$0x1]  ;;  %s1565_s6 = sld [smem:[#allocation5 + $0x100]]  ;;  %s237_s12 = scalar_lea.vmem [#allocation11], %s1543_s24 }
  0x5b   :  { %v198_v23 = vadd.f32 %v197_v0, %v186_v14  ;;  %v208_v24 = vmax.f32 %v207_v19, 0.0  ;;  %v218_v25 = vadd.f32 %v217_v20, %v1465_v6  ;;  %v228_v26 = vadd.f32 %v227_v22, %v225_v21  ;;  %v236_v27 = vld [vmem:[%s235_s11] sm:$0x1]  ;;  %s1568_s13 = sld [smem:[#allocation4 + $0x101]]  ;;  %s246_s0 = scalar_lea.vmem [#allocation9], %s1547_s26 }
  0x5c   :  { %v238_v28 = vld [vmem:[%s237_s12] sm:$0x1]  ;;  %s1572_s14 = sld [smem:[#allocation5 + $0x101]]  ;;  %s248_s1 = scalar_lea.vmem [#allocation11], %s1551_s2 }
  0x5d   :  { %v209_v29 = vadd.f32 %v208_v24, %v198_v23  ;;  %v219_v30 = vmax.f32 %v218_v25, 0.0  ;;  %v229_v31 = vadd.f32 %v228_v26, %v1465_v6  ;;  %v239_v32 = vadd.f32 %v238_v28, %v236_v27  ;;  %v247_v33 = vld [vmem:[%s246_s0] sm:$0x1]  ;;  %s1575_s15 = sld [smem:[#allocation4 + $0x102]]  ;;  %s257_s16 = scalar_lea.vmem [#allocation9], %s1554_s4 }
  0x5e   :  { %v249_v34 = vld [vmem:[%s248_s1] sm:$0x1]  ;;  %s1579_s17 = sld [smem:[#allocation5 + $0x102]]  ;;  %s259_s18 = scalar_lea.vmem [#allocation11], %s1558_s30 }
  0x5f   :  { %v220_v35 = vadd.f32 %v219_v30, %v209_v29  ;;  %v230_v36 = vmax.f32 %v229_v31, 0.0  ;;  %v240_v37 = vadd.f32 %v239_v32, %v1465_v6  ;;  %v250_v38 = vadd.f32 %v249_v34, %v247_v33  ;;  %v258_v39 = vld [vmem:[%s257_s16] sm:$0x1]  ;;  %s1582_s19 = sld [smem:[#allocation4 + $0x103]]  ;;  %s270_s20 = scalar_lea.vmem [#allocation9], %s1561_s10 }
  0x60   :  { %v260_v40 = vld [vmem:[%s259_s18] sm:$0x1]  ;;  %s1586_s21 = sld [smem:[#allocation5 + $0x103]]  ;;  %s272_s22 = scalar_lea.vmem [#allocation11], %s1565_s6 }
  0x61   :  { %v231_v41 = vadd.f32 %v230_v36, %v220_v35  ;;  %v241_v42 = vmax.f32 %v240_v37, 0.0  ;;  %v251_v43 = vadd.f32 %v250_v38, %v1465_v6  ;;  %v261_v44 = vadd.f32 %v260_v40, %v258_v39  ;;  %v271_v45 = vld [vmem:[%s270_s20] sm:$0x1]  ;;  %s1589_s23 = sld [smem:[#allocation4 + $0x104]]  ;;  %s281_s3 = scalar_lea.vmem [#allocation9], %s1568_s13 }
  0x62   :  { %v273_v46 = vld [vmem:[%s272_s22] sm:$0x1]  ;;  %s1593_s24 = sld [smem:[#allocation5 + $0x104]]  ;;  %s283_s25 = scalar_lea.vmem [#allocation11], %s1572_s14 }
  0x63   :  { %v242_v47 = vadd.f32 %v241_v42, %v231_v41  ;;  %v252_v48 = vmax.f32 %v251_v43, 0.0  ;;  %v262_v49 = vadd.f32 %v261_v44, %v1465_v6  ;;  %v274_v50 = vadd.f32 %v273_v46, %v271_v45  ;;  %v282_v51 = vld [vmem:[%s281_s3] sm:$0x1]  ;;  %s1596_s26 = sld [smem:[#allocation4 + $0x105]]  ;;  %s292_s27 = scalar_lea.vmem [#allocation9], %s1575_s15 }
  0x64   :  { %v284_v52 = vld [vmem:[%s283_s25] sm:$0x1]  ;;  %s1600_s2 = sld [smem:[#allocation5 + $0x105]]  ;;  %s294_s28 = scalar_lea.vmem [#allocation11], %s1579_s17 }
  0x65   :  { %v253_v53 = vadd.f32 %v252_v48, %v242_v47  ;;  %v263_v54 = vmax.f32 %v262_v49, 0.0  ;;  %v275_v55 = vadd.f32 %v274_v50, %v1465_v6  ;;  %v285_v56 = vadd.f32 %v284_v52, %v282_v51  ;;  %v293_v57 = vld [vmem:[%s292_s27] sm:$0x1]  ;;  %s1603_s4 = sld [smem:[#allocation4 + $0x106]]  ;;  %s303_s29 = scalar_lea.vmem [#allocation9], %s1582_s19 }
  0x66   :  { %v295_v58 = vld [vmem:[%s294_s28] sm:$0x1]  ;;  %s1607_s30 = sld [smem:[#allocation5 + $0x106]]  ;;  %s305_s9 = scalar_lea.vmem [#allocation11], %s1586_s21 }
  0x67   :  { %v264_v59 = vadd.f32 %v263_v54, %v253_v53  ;;  %v276_v60 = vmax.f32 %v275_v55, 0.0  ;;  %v286_v61 = vadd.f32 %v285_v56, %v1465_v6  ;;  %v296_v62 = vadd.f32 %v295_v58, %v293_v57  ;;  %v304_v63 = vld [vmem:[%s303_s29] sm:$0x1]  ;;  %s1610_s10 = sld [smem:[#allocation4 + $0x107]]  ;;  %s314_s11 = scalar_lea.vmem [#allocation9], %s1589_s23 }
  0x68   :  { %v306_v1 = vld [vmem:[%s305_s9] sm:$0x1]  ;;  %s1614_s6 = sld [smem:[#allocation5 + $0x107]]  ;;  %s316_s12 = scalar_lea.vmem [#allocation11], %s1593_s24 }
  0x69   :  { %265 = vst [vmem:[#allocation2 + $0x1] sm:$0x1] %v264_v59  ;;  %v287_v2 = vmax.f32 %v286_v61, 0.0  ;;  %v297_v3 = vadd.f32 %v296_v62, %v1465_v6  ;;  %v307_v4 = vadd.f32 %v306_v1, %v304_v63  ;;  %v315_v5 = vld [vmem:[%s314_s11] sm:$0x1]  ;;  %s1617_s13 = sld [smem:[#allocation4 + $0x180]] }
  0x6a   :  { %v317_v7 = vld [vmem:[%s316_s12] sm:$0x1]  ;;  %s325_s0 = scalar_lea.vmem [#allocation9], %s1596_s26  ;;  %s1621_s14 = sld [smem:[#allocation5 + $0x180]] }
  0x6b   :  { %v288_v8 = vadd.f32 %v287_v2, %v276_v60  ;;  %v298_v9 = vmax.f32 %v297_v3, 0.0  ;;  %v308_v10 = vadd.f32 %v307_v4, %v1465_v6  ;;  %v318_v11 = vadd.f32 %v317_v7, %v315_v5  ;;  %v326_v12 = vld [vmem:[%s325_s0] sm:$0x1]  ;;  %s327_s1 = scalar_lea.vmem [#allocation11], %s1600_s2  ;;  %s1624_s15 = sld [smem:[#allocation4 + $0x181]] }
  0x6c   :  { %v328_v13 = vld [vmem:[%s327_s1] sm:$0x1]  ;;  %s336_s16 = scalar_lea.vmem [#allocation9], %s1603_s4  ;;  %s1628_s17 = sld [smem:[#allocation5 + $0x181]] }
  0x6d   :  { %v299_v14 = vadd.f32 %v298_v9, %v288_v8  ;;  %v309_v15 = vmax.f32 %v308_v10, 0.0  ;;  %v319_v16 = vadd.f32 %v318_v11, %v1465_v6  ;;  %v329_v17 = vadd.f32 %v328_v13, %v326_v12  ;;  %v337_v18 = vld [vmem:[%s336_s16] sm:$0x1]  ;;  %s338_s18 = scalar_lea.vmem [#allocation11], %s1607_s30  ;;  %s1631_s19 = sld [smem:[#allocation4 + $0x182]] }
  0x6e   :  { %v339_v0 = vld [vmem:[%s338_s18] sm:$0x1]  ;;  %s347_s20 = scalar_lea.vmem [#allocation9], %s1610_s10  ;;  %s1635_s21 = sld [smem:[#allocation5 + $0x182]] }
  0x6f   :  { %v310_v19 = vadd.f32 %v309_v15, %v299_v14  ;;  %v320_v20 = vmax.f32 %v319_v16, 0.0  ;;  %v330_v21 = vadd.f32 %v329_v17, %v1465_v6  ;;  %v340_v22 = vadd.f32 %v339_v0, %v337_v18  ;;  %v348_v23 = vld [vmem:[%s347_s20] sm:$0x1]  ;;  %s349_s22 = scalar_lea.vmem [#allocation11], %s1614_s6  ;;  %s1638_s23 = sld [smem:[#allocation4 + $0x183]] }
  0x70   :  { %v350_v24 = vld [vmem:[%s349_s22] sm:$0x1]  ;;  %s360_s3 = scalar_lea.vmem [#allocation9], %s1617_s13  ;;  %s1642_s24 = sld [smem:[#allocation5 + $0x183]] }
  0x71   :  { %v321_v25 = vadd.f32 %v320_v20, %v310_v19  ;;  %v331_v26 = vmax.f32 %v330_v21, 0.0  ;;  %v341_v27 = vadd.f32 %v340_v22, %v1465_v6  ;;  %v351_v28 = vadd.f32 %v350_v24, %v348_v23  ;;  %v361_v29 = vld [vmem:[%s360_s3] sm:$0x1]  ;;  %s362_s25 = scalar_lea.vmem [#allocation11], %s1621_s14  ;;  %s1645_s26 = sld [smem:[#allocation4 + $0x184]] }
  0x72   :  { %v363_v30 = vld [vmem:[%s362_s25] sm:$0x1]  ;;  %s371_s27 = scalar_lea.vmem [#allocation9], %s1624_s15  ;;  %s1649_s2 = sld [smem:[#allocation5 + $0x184]] }
  0x73   :  { %v332_v31 = vadd.f32 %v331_v26, %v321_v25  ;;  %v342_v32 = vmax.f32 %v341_v27, 0.0  ;;  %v352_v33 = vadd.f32 %v351_v28, %v1465_v6  ;;  %v364_v34 = vadd.f32 %v363_v30, %v361_v29  ;;  %v372_v35 = vld [vmem:[%s371_s27] sm:$0x1]  ;;  %s373_s28 = scalar_lea.vmem [#allocation11], %s1628_s17  ;;  %s1652_s4 = sld [smem:[#allocation4 + $0x185]] }
  0x74   :  { %v374_v36 = vld [vmem:[%s373_s28] sm:$0x1]  ;;  %s382_s29 = scalar_lea.vmem [#allocation9], %s1631_s19  ;;  %s1656_s30 = sld [smem:[#allocation5 + $0x185]] }
  0x75   :  { %v343_v37 = vadd.f32 %v342_v32, %v332_v31  ;;  %v353_v38 = vmax.f32 %v352_v33, 0.0  ;;  %v365_v39 = vadd.f32 %v364_v34, %v1465_v6  ;;  %v375_v40 = vadd.f32 %v374_v36, %v372_v35  ;;  %v383_v41 = vld [vmem:[%s382_s29] sm:$0x1]  ;;  %s384_s9 = scalar_lea.vmem [#allocation11], %s1635_s21  ;;  %s1659_s10 = sld [smem:[#allocation4 + $0x186]] }
  0x76   :  { %v385_v42 = vld [vmem:[%s384_s9] sm:$0x1]  ;;  %s393_s11 = scalar_lea.vmem [#allocation9], %s1638_s23  ;;  %s1663_s6 = sld [smem:[#allocation5 + $0x186]] }
  0x77   :  { %v354_v43 = vadd.f32 %v353_v38, %v343_v37  ;;  %v366_v44 = vmax.f32 %v365_v39, 0.0  ;;  %v376_v45 = vadd.f32 %v375_v40, %v1465_v6  ;;  %v386_v46 = vadd.f32 %v385_v42, %v383_v41  ;;  %v394_v47 = vld [vmem:[%s393_s11] sm:$0x1]  ;;  %s395_s12 = scalar_lea.vmem [#allocation11], %s1642_s24  ;;  %s1666_s13 = sld [smem:[#allocation4 + $0x187]] }
  0x78   :  { %v396_v48 = vld [vmem:[%s395_s12] sm:$0x1]  ;;  %s404_s0 = scalar_lea.vmem [#allocation9], %s1645_s26  ;;  %s1670_s14 = sld [smem:[#allocation5 + $0x187]] }
  0x79   :  { %355 = vst [vmem:[#allocation2 + $0x2] sm:$0x1] %v354_v43  ;;  %v377_v49 = vmax.f32 %v376_v45, 0.0  ;;  %v387_v50 = vadd.f32 %v386_v46, %v1465_v6  ;;  %v397_v51 = vadd.f32 %v396_v48, %v394_v47  ;;  %v405_v52 = vld [vmem:[%s404_s0] sm:$0x1]  ;;  %s406_s1 = scalar_lea.vmem [#allocation11], %s1649_s2 }
  0x7a   :  { %v407_v53 = vld [vmem:[%s406_s1] sm:$0x1]  ;;  %s1673_s15 = sld [smem:[#allocation4 + $0x200]]  ;;  %s415_s16 = scalar_lea.vmem [#allocation9], %s1652_s4 }
  0x7b   :  { %v378_v54 = vadd.f32 %v377_v49, %v366_v44  ;;  %v388_v55 = vmax.f32 %v387_v50, 0.0  ;;  %v398_v56 = vadd.f32 %v397_v51, %v1465_v6  ;;  %v408_v57 = vadd.f32 %v407_v53, %v405_v52  ;;  %v416_v58 = vld [vmem:[%s415_s16] sm:$0x1]  ;;  %s1677_s17 = sld [smem:[#allocation5 + $0x200]]  ;;  %s417_s18 = scalar_lea.vmem [#allocation11], %s1656_s30 }
  0x7c   :  { %v418_v59 = vld [vmem:[%s417_s18] sm:$0x1]  ;;  %s1680_s19 = sld [smem:[#allocation4 + $0x201]]  ;;  %s426_s20 = scalar_lea.vmem [#allocation9], %s1659_s10 }
  0x7d   :  { %v389_v60 = vadd.f32 %v388_v55, %v378_v54  ;;  %v399_v61 = vmax.f32 %v398_v56, 0.0  ;;  %v409_v62 = vadd.f32 %v408_v57, %v1465_v6  ;;  %v419_v63 = vadd.f32 %v418_v59, %v416_v58  ;;  %v427_v1 = vld [vmem:[%s426_s20] sm:$0x1]  ;;  %s1684_s21 = sld [smem:[#allocation5 + $0x201]]  ;;  %s428_s22 = scalar_lea.vmem [#allocation11], %s1663_s6 }
  0x7e   :  { %v429_v2 = vld [vmem:[%s428_s22] sm:$0x1]  ;;  %s1687_s23 = sld [smem:[#allocation4 + $0x202]]  ;;  %s437_s3 = scalar_lea.vmem [#allocation9], %s1666_s13 }
  0x7f   :  { %v400_v3 = vadd.f32 %v399_v61, %v389_v60  ;;  %v410_v4 = vmax.f32 %v409_v62, 0.0  ;;  %v420_v5 = vadd.f32 %v419_v63, %v1465_v6  ;;  %v430_v7 = vadd.f32 %v429_v2, %v427_v1  ;;  %v438_v8 = vld [vmem:[%s437_s3] sm:$0x1]  ;;  %s1691_s24 = sld [smem:[#allocation5 + $0x202]]  ;;  %s439_s25 = scalar_lea.vmem [#allocation11], %s1670_s14 }
  0x80   :  { %v440_v9 = vld [vmem:[%s439_s25] sm:$0x1]  ;;  %s1694_s26 = sld [smem:[#allocation4 + $0x203]]  ;;  %s450_s27 = scalar_lea.vmem [#allocation9], %s1673_s15 }
  0x81   :  { %v411_v10 = vadd.f32 %v410_v4, %v400_v3  ;;  %v421_v11 = vmax.f32 %v420_v5, 0.0  ;;  %v431_v12 = vadd.f32 %v430_v7, %v1465_v6  ;;  %v441_v13 = vadd.f32 %v440_v9, %v438_v8  ;;  %v451_v14 = vld [vmem:[%s450_s27] sm:$0x1]  ;;  %s1698_s2 = sld [smem:[#allocation5 + $0x203]]  ;;  %s452_s28 = scalar_lea.vmem [#allocation11], %s1677_s17 }
  0x82   :  { %v453_v15 = vld [vmem:[%s452_s28] sm:$0x1]  ;;  %s1701_s4 = sld [smem:[#allocation4 + $0x204]]  ;;  %s461_s29 = scalar_lea.vmem [#allocation9], %s1680_s19 }
  0x83   :  { %v422_v16 = vadd.f32 %v421_v11, %v411_v10  ;;  %v432_v17 = vmax.f32 %v431_v12, 0.0  ;;  %v442_v18 = vadd.f32 %v441_v13, %v1465_v6  ;;  %v454_v0 = vadd.f32 %v453_v15, %v451_v14  ;;  %v462_v19 = vld [vmem:[%s461_s29] sm:$0x1]  ;;  %s1705_s30 = sld [smem:[#allocation5 + $0x204]]  ;;  %s463_s9 = scalar_lea.vmem [#allocation11], %s1684_s21 }
  0x84   :  { %v464_v20 = vld [vmem:[%s463_s9] sm:$0x1]  ;;  %s1708_s10 = sld [smem:[#allocation4 + $0x205]]  ;;  %s472_s11 = scalar_lea.vmem [#allocation9], %s1687_s23 }
  0x85   :  { %v433_v21 = vadd.f32 %v432_v17, %v422_v16  ;;  %v443_v22 = vmax.f32 %v442_v18, 0.0  ;;  %v455_v23 = vadd.f32 %v454_v0, %v1465_v6  ;;  %v465_v24 = vadd.f32 %v464_v20, %v462_v19  ;;  %v473_v25 = vld [vmem:[%s472_s11] sm:$0x1]  ;;  %s1712_s6 = sld [smem:[#allocation5 + $0x205]]  ;;  %s474_s12 = scalar_lea.vmem [#allocation11], %s1691_s24 }
  0x86   :  { %v475_v26 = vld [vmem:[%s474_s12] sm:$0x1]  ;;  %s1715_s13 = sld [smem:[#allocation4 + $0x206]]  ;;  %s483_s0 = scalar_lea.vmem [#allocation9], %s1694_s26 }
  0x87   :  { %v444_v27 = vadd.f32 %v443_v22, %v433_v21  ;;  %v456_v28 = vmax.f32 %v455_v23, 0.0  ;;  %v466_v29 = vadd.f32 %v465_v24, %v1465_v6  ;;  %v476_v30 = vadd.f32 %v475_v26, %v473_v25  ;;  %v484_v31 = vld [vmem:[%s483_s0] sm:$0x1]  ;;  %s1719_s14 = sld [smem:[#allocation5 + $0x206]]  ;;  %s485_s1 = scalar_lea.vmem [#allocation11], %s1698_s2 }
  0x88   :  { %v486_v32 = vld [vmem:[%s485_s1] sm:$0x1]  ;;  %s1722_s15 = sld [smem:[#allocation4 + $0x207]]  ;;  %s494_s16 = scalar_lea.vmem [#allocation9], %s1701_s4 }
  0x89   :  { %445 = vst [vmem:[#allocation2 + $0x3] sm:$0x1] %v444_v27  ;;  %v467_v33 = vmax.f32 %v466_v29, 0.0  ;;  %v477_v34 = vadd.f32 %v476_v30, %v1465_v6  ;;  %v487_v35 = vadd.f32 %v486_v32, %v484_v31  ;;  %v495_v36 = vld [vmem:[%s494_s16] sm:$0x1]  ;;  %s1726_s17 = sld [smem:[#allocation5 + $0x207]] }
  0x8a   :  { %s496_s18 = scalar_lea.vmem [#allocation11], %s1705_s30  ;;  %s1729_s19 = sld [smem:[#allocation4 + $0x280]] }
  0x8b   :  { %v497_v37 = vld [vmem:[%s496_s18] sm:$0x1]  ;;  %v468_v38 = vadd.f32 %v467_v33, %v456_v28  ;;  %v478_v39 = vmax.f32 %v477_v34, 0.0  ;;  %v488_v40 = vadd.f32 %v487_v35, %v1465_v6  ;;  %s505_s20 = scalar_lea.vmem [#allocation9], %s1708_s10  ;;  %s1733_s21 = sld [smem:[#allocation5 + $0x280]] }
  0x8c   :  { %v498_v41 = vadd.f32 %v497_v37, %v495_v36  ;;  %v506_v42 = vld [vmem:[%s505_s20] sm:$0x1]  ;;  %s507_s22 = scalar_lea.vmem [#allocation11], %s1712_s6  ;;  %s1736_s23 = sld [smem:[#allocation4 + $0x281]] }
  0x8d   :  { %v508_v43 = vld [vmem:[%s507_s22] sm:$0x1]  ;;  %v479_v44 = vadd.f32 %v478_v39, %v468_v38  ;;  %v489_v45 = vmax.f32 %v488_v40, 0.0  ;;  %s516_s3 = scalar_lea.vmem [#allocation9], %s1715_s13  ;;  %s1740_s24 = sld [smem:[#allocation5 + $0x281]] }
  0x8e   :  { %v499_v46 = vadd.f32 %v498_v41, %v1465_v6  ;;  %v509_v47 = vadd.f32 %v508_v43, %v506_v42  ;;  %v517_v48 = vld [vmem:[%s516_s3] sm:$0x1]  ;;  %s518_s25 = scalar_lea.vmem [#allocation11], %s1719_s14  ;;  %s1743_s26 = sld [smem:[#allocation4 + $0x282]] }
  0x8f   :  { %v519_v49 = vld [vmem:[%s518_s25] sm:$0x1]  ;;  %v490_v50 = vadd.f32 %v489_v45, %v479_v44  ;;  %s527_s27 = scalar_lea.vmem [#allocation9], %s1722_s15  ;;  %s1747_s2 = sld [smem:[#allocation5 + $0x282]] }
  0x90   :  { %v500_v51 = vmax.f32 %v499_v46, 0.0  ;;  %v510_v52 = vadd.f32 %v509_v47, %v1465_v6  ;;  %v520_v53 = vadd.f32 %v519_v49, %v517_v48  ;;  %v528_v54 = vld [vmem:[%s527_s27] sm:$0x1]  ;;  %s529_s28 = scalar_lea.vmem [#allocation11], %s1726_s17  ;;  %s1750_s4 = sld [smem:[#allocation4 + $0x283]] }
  0x91   :  { %v530_v55 = vld [vmem:[%s529_s28] sm:$0x1]  ;;  %s540_s29 = scalar_lea.vmem [#allocation9], %s1729_s19  ;;  %s1754_s30 = sld [smem:[#allocation5 + $0x283]] }
  0x92   :  { %v501_v56 = vadd.f32 %v500_v51, %v490_v50  ;;  %v511_v57 = vmax.f32 %v510_v52, 0.0  ;;  %v521_v58 = vadd.f32 %v520_v53, %v1465_v6  ;;  %v531_v59 = vadd.f32 %v530_v55, %v528_v54  ;;  %v541_v60 = vld [vmem:[%s540_s29] sm:$0x1]  ;;  %s542_s9 = scalar_lea.vmem [#allocation11], %s1733_s21  ;;  %s1757_s10 = sld [smem:[#allocation4 + $0x284]] }
  0x93   :  { %v543_v61 = vld [vmem:[%s542_s9] sm:$0x1]  ;;  %s551_s11 = scalar_lea.vmem [#allocation9], %s1736_s23  ;;  %s1761_s6 = sld [smem:[#allocation5 + $0x284]] }
  0x94   :  { %v512_v62 = vadd.f32 %v511_v57, %v501_v56  ;;  %v522_v63 = vmax.f32 %v521_v58, 0.0  ;;  %v532_v1 = vadd.f32 %v531_v59, %v1465_v6  ;;  %v544_v2 = vadd.f32 %v543_v61, %v541_v60  ;;  %v552_v3 = vld [vmem:[%s551_s11] sm:$0x1]  ;;  %s553_s12 = scalar_lea.vmem [#allocation11], %s1740_s24  ;;  %s1764_s13 = sld [smem:[#allocation4 + $0x285]] }
  0x95   :  { %v554_v4 = vld [vmem:[%s553_s12] sm:$0x1]  ;;  %s562_s0 = scalar_lea.vmem [#allocation9], %s1743_s26  ;;  %s1768_s14 = sld [smem:[#allocation5 + $0x285]] }
  0x96   :  { %v523_v5 = vadd.f32 %v522_v63, %v512_v62  ;;  %v533_v7 = vmax.f32 %v532_v1, 0.0  ;;  %v545_v8 = vadd.f32 %v544_v2, %v1465_v6  ;;  %v555_v9 = vadd.f32 %v554_v4, %v552_v3  ;;  %v563_v10 = vld [vmem:[%s562_s0] sm:$0x1]  ;;  %s564_s1 = scalar_lea.vmem [#allocation11], %s1747_s2  ;;  %s1771_s15 = sld [smem:[#allocation4 + $0x286]] }
  0x97   :  { %v565_v11 = vld [vmem:[%s564_s1] sm:$0x1]  ;;  %s573_s16 = scalar_lea.vmem [#allocation9], %s1750_s4  ;;  %s1775_s17 = sld [smem:[#allocation5 + $0x286]] }
  0x98   :  { %v534_v12 = vadd.f32 %v533_v7, %v523_v5  ;;  %v546_v13 = vmax.f32 %v545_v8, 0.0  ;;  %v556_v14 = vadd.f32 %v555_v9, %v1465_v6  ;;  %v566_v15 = vadd.f32 %v565_v11, %v563_v10  ;;  %v574_v16 = vld [vmem:[%s573_s16] sm:$0x1]  ;;  %s575_s18 = scalar_lea.vmem [#allocation11], %s1754_s30  ;;  %s1778_s19 = sld [smem:[#allocation4 + $0x287]] }
  0x99   :  { %v576_v17 = vld [vmem:[%s575_s18] sm:$0x1]  ;;  %s584_s20 = scalar_lea.vmem [#allocation9], %s1757_s10  ;;  %s1782_s21 = sld [smem:[#allocation5 + $0x287]] }
  0x9a   :  { %535 = vst [vmem:[#allocation2 + $0x4] sm:$0x1] %v534_v12  ;;  %v557_v18 = vmax.f32 %v556_v14, 0.0  ;;  %v567_v0 = vadd.f32 %v566_v15, %v1465_v6  ;;  %v577_v19 = vadd.f32 %v576_v17, %v574_v16  ;;  %v585_v20 = vld [vmem:[%s584_s20] sm:$0x1]  ;;  %s586_s22 = scalar_lea.vmem [#allocation11], %s1761_s6 }
  0x9b   :  { %v587_v21 = vld [vmem:[%s586_s22] sm:$0x1]  ;;  %s1785_s23 = sld [smem:[#allocation4 + $0x300]]  ;;  %s595_s3 = scalar_lea.vmem [#allocation9], %s1764_s13 }
  0x9c   :  { %v558_v22 = vadd.f32 %v557_v18, %v546_v13  ;;  %v568_v23 = vmax.f32 %v567_v0, 0.0  ;;  %v578_v24 = vadd.f32 %v577_v19, %v1465_v6  ;;  %v588_v25 = vadd.f32 %v587_v21, %v585_v20  ;;  %v596_v26 = vld [vmem:[%s595_s3] sm:$0x1]  ;;  %s1789_s24 = sld [smem:[#allocation5 + $0x300]]  ;;  %s597_s25 = scalar_lea.vmem [#allocation11], %s1768_s14 }
  0x9d   :  { %v598_v27 = vld [vmem:[%s597_s25] sm:$0x1]  ;;  %s1792_s26 = sld [smem:[#allocation4 + $0x301]]  ;;  %s606_s27 = scalar_lea.vmem [#allocation9], %s1771_s15 }
  0x9e   :  { %v569_v28 = vadd.f32 %v568_v23, %v558_v22  ;;  %v579_v29 = vmax.f32 %v578_v24, 0.0  ;;  %v589_v30 = vadd.f32 %v588_v25, %v1465_v6  ;;  %v599_v31 = vadd.f32 %v598_v27, %v596_v26  ;;  %v607_v32 = vld [vmem:[%s606_s27] sm:$0x1]  ;;  %s1796_s2 = sld [smem:[#allocation5 + $0x301]]  ;;  %s608_s28 = scalar_lea.vmem [#allocation11], %s1775_s17 }
  0x9f   :  { %v609_v33 = vld [vmem:[%s608_s28] sm:$0x1]  ;;  %s1799_s4 = sld [smem:[#allocation4 + $0x302]]  ;;  %s617_s29 = scalar_lea.vmem [#allocation9], %s1778_s19 }
  0xa0   :  { %v580_v34 = vadd.f32 %v579_v29, %v569_v28  ;;  %v590_v35 = vmax.f32 %v589_v30, 0.0  ;;  %v600_v36 = vadd.f32 %v599_v31, %v1465_v6  ;;  %v610_v37 = vadd.f32 %v609_v33, %v607_v32  ;;  %v618_v38 = vld [vmem:[%s617_s29] sm:$0x1]  ;;  %s1803_s30 = sld [smem:[#allocation5 + $0x302]]  ;;  %s619_s9 = scalar_lea.vmem [#allocation11], %s1782_s21 }
  0xa1   :  { %v620_v39 = vld [vmem:[%s619_s9] sm:$0x1]  ;;  %s1806_s10 = sld [smem:[#allocation4 + $0x303]]  ;;  %s630_s12 = scalar_lea.vmem [#allocation9], %s1785_s23 }
  0xa2   :  { %v591_v40 = vadd.f32 %v590_v35, %v580_v34  ;;  %v601_v41 = vmax.f32 %v600_v36, 0.0  ;;  %v1811_v42 = vld [vmem:[%s1917_s5] sm:$0x1]  ;;  %v621_v43 = vadd.f32 %v620_v39, %v618_v38  ;;  %s1815_s13 = sld [smem:[#allocation5 + $0x303]]  ;;  %s632_s0 = scalar_lea.vmem [#allocation11], %s1789_s24 }
  0xa3   :  { %v611_v6 = vadd.f32 %v1811_v42, %v610_v37  ;;  %v631_v44 = vld [vmem:[%s630_s12] sm:$0x1]  ;;  %s1818_s14 = sld [smem:[#allocation4 + $0x304]]  ;;  %s641_s5 = scalar_lea.vmem [#allocation9], %s1792_s26 }
  0xa4   :  { %v633_v45 = vld [vmem:[%s632_s0] sm:$0x1]  ;;  %v602_v46 = vadd.f32 %v601_v41, %v591_v40  ;;  %v622_v48 = vadd.f32 %v1811_v42, %v621_v43  ;;  %s1822_s1 = sld [smem:[#allocation5 + $0x304]]  ;;  %s643_s15 = scalar_lea.vmem [#allocation11], %s1796_s2 }
  0xa5   :  { %v612_v47 = vmax.f32 %v611_v6, 0.0  ;;  %v634_v49 = vadd.f32 %v633_v45, %v631_v44  ;;  %v642_v50 = vld [vmem:[%s641_s5] sm:$0x1]  ;;  %s1825_s16 = sld [smem:[#allocation4 + $0x305]]  ;;  %s652_s17 = scalar_lea.vmem [#allocation9], %s1799_s4 }
  0xa6   :  { %v644_v51 = vld [vmem:[%s643_s15] sm:$0x1]  ;;  %v623_v53 = vmax.f32 %v622_v48, 0.0  ;;  %s1829_s18 = sld [smem:[#allocation5 + $0x305]]  ;;  %s654_s19 = scalar_lea.vmem [#allocation11], %s1803_s30 }
  0xa7   :  { %v613_v52 = vadd.f32 %v612_v47, %v602_v46  ;;  %v635_v54 = vadd.f32 %v1811_v42, %v634_v49  ;;  %v645_v55 = vadd.f32 %v644_v51, %v642_v50  ;;  %v653_v56 = vld [vmem:[%s652_s17] sm:$0x1]  ;;  %s1832_s20 = sld [smem:[#allocation4 + $0x306]]  ;;  %s663_s21 = scalar_lea.vmem [#allocation9], %s1806_s10 }
  0xa8   :  { %v655_v57 = vld [vmem:[%s654_s19] sm:$0x1]  ;;  %s1836_s22 = sld [smem:[#allocation5 + $0x306]]  ;;  %s665_s23 = scalar_lea.vmem [#allocation11], %s1815_s13 }
  0xa9   :  { %v624_v58 = vadd.f32 %v623_v53, %v613_v52  ;;  %v636_v59 = vmax.f32 %v635_v54, 0.0  ;;  %v646_v60 = vadd.f32 %v1811_v42, %v645_v55  ;;  %v656_v61 = vadd.f32 %v655_v57, %v653_v56  ;;  %v664_v62 = vld [vmem:[%s663_s21] sm:$0x1]  ;;  %s1839_s3 = sld [smem:[#allocation4 + $0x307]]  ;;  %s674_s24 = scalar_lea.vmem [#allocation9], %s1818_s14 }
  0xaa   :  { %v666_v63 = vld [vmem:[%s665_s23] sm:$0x1]  ;;  %s1843_s25 = sld [smem:[#allocation5 + $0x307]]  ;;  %s676_s26 = scalar_lea.vmem [#allocation11], %s1822_s1 }
  0xab   :  { %625 = vst [vmem:[#allocation2 + $0x5] sm:$0x1] %v624_v58  ;;  %v647_v1 = vmax.f32 %v646_v60, 0.0  ;;  %v657_v2 = vadd.f32 %v1811_v42, %v656_v61  ;;  %v667_v3 = vadd.f32 %v666_v63, %v664_v62  ;;  %v675_v4 = vld [vmem:[%s674_s24] sm:$0x1]  ;;  %s1846_s27 = sld [smem:[#allocation4 + $0x380]] }
  0xac   :  { %v677_v5 = vld [vmem:[%s676_s26] sm:$0x1]  ;;  %s685_s2 = scalar_lea.vmem [#allocation9], %s1825_s16  ;;  %s1850_s28 = sld [smem:[#allocation5 + $0x380]] }
  0xad   :  { %v648_v7 = vadd.f32 %v647_v1, %v636_v59  ;;  %v658_v8 = vmax.f32 %v657_v2, 0.0  ;;  %v668_v9 = vadd.f32 %v1811_v42, %v667_v3  ;;  %v678_v10 = vadd.f32 %v677_v5, %v675_v4  ;;  %v686_v11 = vld [vmem:[%s685_s2] sm:$0x1]  ;;  %s687_s4 = scalar_lea.vmem [#allocation11], %s1829_s18  ;;  %s1853_s29 = sld [smem:[#allocation4 + $0x381]] }
  0xae   :  { %v688_v12 = vld [vmem:[%s687_s4] sm:$0x1]  ;;  %s696_s30 = scalar_lea.vmem [#allocation9], %s1832_s20  ;;  %s1857_s9 = sld [smem:[#allocation5 + $0x381]] }
  0xaf   :  { %v659_v13 = vadd.f32 %v658_v8, %v648_v7  ;;  %v669_v14 = vmax.f32 %v668_v9, 0.0  ;;  %v679_v15 = vadd.f32 %v1811_v42, %v678_v10  ;;  %v689_v16 = vadd.f32 %v688_v12, %v686_v11  ;;  %v697_v17 = vld [vmem:[%s696_s30] sm:$0x1]  ;;  %s698_s10 = scalar_lea.vmem [#allocation11], %s1836_s22  ;;  %s1860_s11 = sld [smem:[#allocation4 + $0x382]] }
  0xb0   :  { %v699_v18 = vld [vmem:[%s698_s10] sm:$0x1]  ;;  %s707_s6 = scalar_lea.vmem [#allocation9], %s1839_s3  ;;  %s1864_s12 = sld [smem:[#allocation5 + $0x382]] }
  0xb1   :  { %v670_v0 = vadd.f32 %v669_v14, %v659_v13  ;;  %v680_v19 = vmax.f32 %v679_v15, 0.0  ;;  %v690_v20 = vadd.f32 %v1811_v42, %v689_v16  ;;  %v700_v21 = vadd.f32 %v699_v18, %v697_v17  ;;  %v708_v22 = vld [vmem:[%s707_s6] sm:$0x1]  ;;  %s709_s13 = scalar_lea.vmem [#allocation11], %s1843_s25  ;;  %s1867_s0 = sld [smem:[#allocation4 + $0x383]] }
  0xb2   :  { %v710_v23 = vld [vmem:[%s709_s13] sm:$0x1]  ;;  %s720_s14 = scalar_lea.vmem [#allocation9], %s1846_s27  ;;  %s1871_s5 = sld [smem:[#allocation5 + $0x383]] }
  0xb3   :  { %v681_v24 = vadd.f32 %v680_v19, %v670_v0  ;;  %v691_v25 = vmax.f32 %v690_v20, 0.0  ;;  %v701_v26 = vadd.f32 %v1811_v42, %v700_v21  ;;  %v711_v27 = vadd.f32 %v710_v23, %v708_v22  ;;  %v721_v28 = vld [vmem:[%s720_s14] sm:$0x1]  ;;  %s722_s1 = scalar_lea.vmem [#allocation11], %s1850_s28  ;;  %s1874_s15 = sld [smem:[#allocation4 + $0x384]] }
  0xb4   :  { %v723_v29 = vld [vmem:[%s722_s1] sm:$0x1]  ;;  %s731_s16 = scalar_lea.vmem [#allocation9], %s1853_s29  ;;  %s1878_s17 = sld [smem:[#allocation5 + $0x384]] }
  0xb5   :  { %v692_v30 = vadd.f32 %v691_v25, %v681_v24  ;;  %v702_v31 = vmax.f32 %v701_v26, 0.0  ;;  %v712_v32 = vadd.f32 %v1811_v42, %v711_v27  ;;  %v724_v33 = vadd.f32 %v723_v29, %v721_v28  ;;  %v732_v34 = vld [vmem:[%s731_s16] sm:$0x1]  ;;  %s733_s18 = scalar_lea.vmem [#allocation11], %s1857_s9  ;;  %s1881_s19 = sld [smem:[#allocation4 + $0x385]] }
  0xb6   :  { %v734_v35 = vld [vmem:[%s733_s18] sm:$0x1]  ;;  %s742_s20 = scalar_lea.vmem [#allocation9], %s1860_s11  ;;  %s1885_s21 = sld [smem:[#allocation5 + $0x385]] }
  0xb7   :  { %v703_v36 = vadd.f32 %v702_v31, %v692_v30  ;;  %v713_v37 = vmax.f32 %v712_v32, 0.0  ;;  %v725_v38 = vadd.f32 %v1811_v42, %v724_v33  ;;  %v735_v39 = vadd.f32 %v734_v35, %v732_v34  ;;  %v743_v40 = vld [vmem:[%s742_s20] sm:$0x1]  ;;  %s744_s22 = scalar_lea.vmem [#allocation11], %s1864_s12  ;;  %s1888_s23 = sld [smem:[#allocation4 + $0x386]] }
  0xb8   :  { %v745_v41 = vld [vmem:[%s744_s22] sm:$0x1]  ;;  %s753_s3 = scalar_lea.vmem [#allocation9], %s1867_s0  ;;  %s1177_s24 = sld [smem:[#allocation5 + $0x386]] }
  0xb9   :  { %v714_v6 = vadd.f32 %v713_v37, %v703_v36  ;;  %v726_v43 = vmax.f32 %v725_v38, 0.0  ;;  %v736_v44 = vadd.f32 %v1811_v42, %v735_v39  ;;  %v746_v45 = vadd.f32 %v745_v41, %v743_v40  ;;  %v754_v46 = vld [vmem:[%s753_s3] sm:$0x1]  ;;  %s755_s25 = scalar_lea.vmem [#allocation11], %s1871_s5  ;;  %s1893_s26 = sld [smem:[#allocation4 + $0x387]] }
  0xba   :  { %v756_v47 = vld [vmem:[%s755_s25] sm:$0x1]  ;;  %s764_s27 = scalar_lea.vmem [#allocation9], %s1874_s15  ;;  %s1179_s2 = sld [smem:[#allocation5 + $0x387]] }
  0xbb   :  { %715 = vst [vmem:[#allocation2 + $0x6] sm:$0x1] %v714_v6  ;;  %v737_v48 = vmax.f32 %v736_v44, 0.0  ;;  %v747_v49 = vadd.f32 %v1811_v42, %v746_v45  ;;  %v757_v50 = vadd.f32 %v756_v47, %v754_v46  ;;  %v765_v51 = vld [vmem:[%s764_s27] sm:$0x1]  ;;  %s766_s28 = scalar_lea.vmem [#allocation11], %s1878_s17 }
  0xbc   :  { %v767_v52 = vld [vmem:[%s766_s28] sm:$0x1]  ;;  %s775_s4 = scalar_lea.vmem [#allocation9], %s1881_s19  ;;  %s777_s29 = scalar_lea.vmem [#allocation11], %s1885_s21 }
  0xbd   :  { %v738_v53 = vadd.f32 %v737_v48, %v726_v43  ;;  %v748_v54 = vmax.f32 %v747_v49, 0.0  ;;  %v758_v55 = vadd.f32 %v1811_v42, %v757_v50  ;;  %v768_v56 = vadd.f32 %v767_v52, %v765_v51  ;;  %v776_v57 = vld [vmem:[%s775_s4] sm:$0x1]  ;;  %s786_s30 = scalar_lea.vmem [#allocation9], %s1888_s23  ;;  %s1383_s13 = smov [#allocation14]  }
  0xbe   :  { %v778_v58 = vld [vmem:[%s777_s29] sm:$0x1]  ;;  %s788_s9 = scalar_lea.vmem [#allocation11], %s1177_s24  ;;  %s915_s0 = sshll.u32 %s1383_s13, 4  ;;  %s916_s0 = int_to_ptr.vmem [resolvable:$true] %s915_s0 }
  0xbf   :  { %v749_v59 = vadd.f32 %v748_v54, %v738_v53  ;;  %v759_v60 = vmax.f32 %v758_v55, 0.0  ;;  %v769_v61 = vadd.f32 %v1811_v42, %v768_v56  ;;  %v779_v62 = vadd.f32 %v778_v58, %v776_v57  ;;  %v787_v63 = vld [vmem:[%s786_s30] sm:$0x1]  ;;  %s797_s10 = scalar_lea.vmem [#allocation9], %s1893_s26  ;;  %s1343_s14 = scalar_lea.vmem %s916_s0, 128 }
  0xc0   :  { %v789_v1 = vld [vmem:[%s788_s9] sm:$0x1]  ;;  %s799_s11 = scalar_lea.vmem [#allocation11], %s1179_s2  ;;  %p1344_p6 = scmp.ne.s32.totalorder %s916_s0, %s1343_s14 }
  0xc1   :  { %v760_v2 = vadd.f32 %v759_v60, %v749_v59  ;;  %v770_v3 = vmax.f32 %v769_v61, 0.0  ;;  %v780_v4 = vadd.f32 %v1811_v42, %v779_v62  ;;  %v790_v5 = vadd.f32 %v789_v1, %v787_v63  ;;  %v798_v7 = vld [vmem:[%s797_s10] sm:$0x1]  ;;  %p1348_p7 = scmp.lt.s32.totalorder %s916_s0, %s916_s0  ;;  %p1349_p8 = scmp.lt.s32.totalorder %s1343_s14, %s1343_s14 }
  0xc2   :  { %v800_v8 = vld [vmem:[%s799_s11] sm:$0x1] }
  0xc3   :  { %v771_v9 = vadd.f32 %v770_v3, %v760_v2  ;;  %v781_v10 = vmax.f32 %v780_v4, 0.0  ;;  %v791_v11 = vadd.f32 %v1811_v42, %v790_v5  ;;  %v801_v12 = vadd.f32 %v800_v8, %v798_v7  ;;  %v1180_v23 = vld [vmem:[%s1919_s7] ss:$0 sm:$0xff]  ;;  %p1350_p9 = por %p1349_p8, %p1348_p7 }
  0xc4   :  { %v810_v13 = vpop.xlane.xlu0 %809 }
  0xc5   :  { %v782_v14 = vadd.f32 %v781_v10, %v771_v9  ;;  %v792_v15 = vmax.f32 %v791_v11, 0.0  ;;  %v802_v16 = vadd.f32 %v1811_v42, %v801_v12  ;;  %v811_v17 = vmax.f32 %v810_v13, 1.0  ;;  %p1351_p10 = pnand %p1350_p9, %p1344_p6 }
  0xc7   :  { %v793_v18 = vadd.f32 %v792_v15, %v782_v14  ;;  %v803_v0 = vmax.f32 %v802_v16, 0.0  ;;  %1244 = vrcp.f32 %v811_v17 }
  0xc9   :  { %v804_v19 = vadd.f32 %v803_v0, %v793_v18 }
  0xcb   :  { %805 = vst [vmem:[#allocation2 + $0x7] sm:$0x1] %v804_v19 }
  0xd2   :  { %v812_v20 = vld [vmem:[#allocation2] sm:$0xff] }
  0xd4   :  { %v1245_v21 = vpop.eup %1244 }
  0xd5   :  { %v814_v22 = vmul.f32 %v1245_v21, %v812_v20 }
  0xd7   :  { %1231 = vmatmul.mubr.f32.vlgmr.msra.gmra.mxu0 %v814_v22 }
 0x197   :  { %v904_v24 = vpop.f32.mrf.mxu0 }
 0x198   :  { %v905_v25 = vadd.f32 %v1180_v23, %v904_v24 }
 0x199   :  { %v1232_v42 = vpop.f32.mrf.mxu0 }
 0x19a   :  { %908 = vst [vmem:[#allocation14] sm:$0xff] %v905_v25 }
 0x19b   :  { %1354 = shalt.err (!%p1351_p10)
}
 0x19c   :  { %918 = dma.vmem_to_hbm [thread:$0]  %s916_s0, 128, %s1920_s8, [#allocation8]  }
 0x19d   :  { %1371 = dma.done.wait [#allocation8], 128  }
 0x19e   :  { %1372 = vsyncadd [#allocation8], 4294967168 }
 0x19f   :  { %922 = vsyncpa [#allocation7], 1 }
 0x1a0   :  { %923 = vsyncpa [#allocation10], 1 }
 0x1a1   :  { %924 = vsyncpa [#allocation13], 1 }
 0x1a2   :  { %925 = vsyncpa [#allocation8], 1 }

</bundles_post_ra>
